<compile_context>
chip_gen: v7x
topology: tpu7x:2x2x1
jax: 0.10.0
libtpu: 0.0.40
codegen_flags: <defaults>
</compile_context>

<pallas_src>
import functools

import jax
import jax.numpy as jnp
from jax.experimental import pallas as pl
from jax.experimental.pallas import tpu as pltpu


# ----------------------------------------------------------------------------
# Fused kernel: all LSTM layers + FC in one invocation.
# PyTorch gate order [i, f, g, o], gates concatenated along the lane axis.
# ----------------------------------------------------------------------------
def _make_fused_kernel(n_layers, T, Bp, H):
    def kernel(*args):
        # ---- unpack (n_layers static -> pure trace-time Python)
        x_ref = args[0]                                    # (T*Bp, E)   bf16
        layer_refs = [
            (args[1 + 3 * l], args[2 + 3 * l], args[3 + 3 * l])
            for l in range(n_layers)
        ]                                                  # wih (in,4H) bf16, whh (H,4H) bf16, b (1,4H) f32
        wfc_ref = args[1 + 3 * n_layers]                   # (H, Op)     bf16
        bfc_ref = args[2 + 3 * n_layers]                   # (1, Op)     f32
        out_ref = args[3 + 3 * n_layers]                   # (T*Bp, Op)  f32
        act_ref = args[4 + 3 * n_layers]                   # (T*Bp, H)   f32 scratch
        pre_ref = args[5 + 3 * n_layers]                   # (T*Bp, 4H)  f32 scratch

        for layer in range(n_layers):
            wih_ref, whh_ref, b_ref = layer_refs[layer]

            # Layer input: embedded tokens for layer 0, previous layer's
            # hidden states (already resident in VMEM scratch) otherwise.
            x_in = (x_ref[...] if layer == 0
                    else act_ref[...].astype(jnp.bfloat16))

            # Hoisted input projection for ALL timesteps: single lane-dense
            # (T*Bp, in) @ (in, 4H) MXU matmul + bias, off the serial path.
            pre_ref[...] = (
                jnp.dot(x_in, wih_ref[...],
                        preferred_element_type=jnp.float32)
                + b_ref[...]                                # (1, 4H) broadcasts
            )

            # Recurrent weights hoisted out of the time loop.
            whh = whh_ref[...]                              # (H, 4H) bf16

            # Zero initial state (PyTorch default h0 = c0 = 0), carried as
            # values -> no per-step VMEM state traffic.
            h = jnp.zeros((Bp, H), jnp.float32)
            c = jnp.zeros((Bp, H), jnp.float32)

            # Fully unrolled time loop (T small & static): static,
            # sublane-aligned row windows.
            for t in range(T):
                r0, r1 = t * Bp, (t + 1) * Bp
                gates = (
                    pre_ref[r0:r1, :]
                    + jnp.dot(h.astype(jnp.bfloat16), whh,
                              preferred_element_type=jnp.float32)
                )                                           # (Bp, 4H) f32
                i_g = jax.nn.sigmoid(gates[:, 0 * H:1 * H])
                f_g = jax.nn.sigmoid(gates[:, 1 * H:2 * H])
                g_g = jnp.tanh(gates[:, 2 * H:3 * H])
                o_g = jax.nn.sigmoid(gates[:, 3 * H:4 * H])

                c = f_g * c + i_g * g_g
                h = o_g * jnp.tanh(c)
                act_ref[r0:r1, :] = h
            # inter-layer dropout -> identity (inference)

        # Final linear projection over all timesteps (single lane-dense
        # MXU matmul into the padded-O output slab).
        out_ref[...] = (
            jnp.dot(act_ref[...].astype(jnp.bfloat16), wfc_ref[...],
                    preferred_element_type=jnp.float32)
            + bfc_ref[...]
        )

    return kernel


def fused_ner_kernel(x_flat, layer_ws, wfc_pad, bfc_pad, *, T, Bp):
    """x_flat: (T*Bp, E) bf16, time-major (row = t*Bp + b).
    layer_ws: list of (wih (in,4H) bf16, whh (H,4H) bf16, b (1,4H) f32).
    wfc_pad: (H, Op) bf16, Op padded to 128.  bfc_pad: (1, Op) f32."""
    n_layers = len(layer_ws)
    N, _ = x_flat.shape
    H = layer_ws[0][1].shape[0]
    Op = wfc_pad.shape[1]

    kernel = _make_fused_kernel(n_layers, T, Bp, H)

    in_specs = [pl.BlockSpec(x_flat.shape, lambda i: (0, 0))]
    inputs = [x_flat]
    for (wih, whh, b) in layer_ws:
        in_specs += [
            pl.BlockSpec(wih.shape, lambda i: (0, 0)),
            pl.BlockSpec(whh.shape, lambda i: (0, 0)),
            pl.BlockSpec(b.shape, lambda i: (0, 0)),
        ]
        inputs += [wih, whh, b]
    in_specs += [
        pl.BlockSpec(wfc_pad.shape, lambda i: (0, 0)),
        pl.BlockSpec(bfc_pad.shape, lambda i: (0, 0)),
    ]
    inputs += [wfc_pad, bfc_pad]

    return pl.pallas_call(
        kernel,
        out_shape=jax.ShapeDtypeStruct((N, Op), jnp.float32),
        grid_spec=pltpu.PrefetchScalarGridSpec(
            num_scalar_prefetch=0,
            grid=(1,),
            in_specs=in_specs,
            out_specs=pl.BlockSpec((N, Op), lambda i: (0, 0)),
            scratch_shapes=[
                pltpu.VMEM((N, H), jnp.float32),        # act: layer output slab
                pltpu.VMEM((N, 4 * H), jnp.float32),    # pre: hoisted x@Wih (+b)
            ],
        ),
        compiler_params=pltpu.CompilerParams(
            # single grid step; the recurrence lives inside the kernel body
            dimension_semantics=("arbitrary",),
            vmem_limit_bytes=32 * 1024 * 1024,
        ),
    )(*inputs)


# ----------------------------------------------------------------------------
# Parameter construction (mirrors nn.Module __init__ shapes), pre-transposed
# and gate-concatenated for the kernel; MXU operands cast to bf16.
# ----------------------------------------------------------------------------
def init_params(key, vocab_size, embedding_dim, hidden_dim, output_dim,
                n_layers, o_pad=128):
    params = {}
    keys = jax.random.split(key, 1 + 4 * n_layers + 2)
    kidx = 0

    # nn.Embedding(vocab_size, embedding_dim) ~ N(0, 1)
    params["embedding"] = jax.random.normal(
        keys[kidx], (vocab_size, embedding_dim), jnp.float32)
    kidx += 1

    H = hidden_dim
    scale = 1.0 / jnp.sqrt(hidden_dim)
    for layer in range(n_layers):
        in_dim = embedding_dim if layer == 0 else hidden_dim
        w_ih = jax.random.uniform(keys[kidx], (4 * H, in_dim),
                                  jnp.float32, -scale, scale); kidx += 1
        w_hh = jax.random.uniform(keys[kidx], (4 * H, H),
                                  jnp.float32, -scale, scale); kidx += 1
        b_ih = jax.random.uniform(keys[kidx], (4 * H,),
                                  jnp.float32, -scale, scale); kidx += 1
        b_hh = jax.random.uniform(keys[kidx], (4 * H,),
                                  jnp.float32, -scale, scale); kidx += 1
        # PyTorch stacks gates [i, f, g, o] along dim 0; transposing gives the
        # gates concatenated along the lane axis: x @ wih_cat -> (., 4H).
        params[f"wih_{layer}"] = w_ih.T.astype(jnp.bfloat16)        # (in, 4H)
        params[f"whh_{layer}"] = w_hh.T.astype(jnp.bfloat16)        # (H, 4H)
        params[f"b_{layer}"] = (b_ih + b_hh).reshape(1, 4 * H)      # (1, 4H) f32

    # nn.Linear(hidden_dim, output_dim), output dim padded to 128 lanes.
    fc_scale = 1.0 / jnp.sqrt(hidden_dim)
    w_fc = jax.random.uniform(keys[kidx], (output_dim, hidden_dim),
                              jnp.float32, -fc_scale, fc_scale); kidx += 1
    b_fc = jax.random.uniform(keys[kidx], (output_dim,),
                              jnp.float32, -fc_scale, fc_scale); kidx += 1
    Op = max(o_pad, ((output_dim + 127) // 128) * 128)
    wfc_pad = jnp.zeros((hidden_dim, Op), jnp.float32).at[:, :output_dim].set(w_fc.T)
    bfc_pad = jnp.zeros((1, Op), jnp.float32).at[0, :output_dim].set(b_fc)
    params["w_fc_t"] = wfc_pad.astype(jnp.bfloat16)   # (H, Op)
    params["b_fc"] = bfc_pad                          # (1, Op) f32
    return params


# ----------------------------------------------------------------------------
# Full forward pass (matches NERModel.forward in eval mode).
# ----------------------------------------------------------------------------
@functools.partial(jax.jit, static_argnames=("n_layers", "output_dim"))
def ner_forward(tokens, params, n_layers, output_dim):
    # tokens: (B, T) int32
    B, T = tokens.shape
    # Embedding lookup directly in time-major order (gather on tokens.T), so
    # no full-activation transpose is needed before the kernel.
    emb_tm = jnp.take(params["embedding"], tokens.T, axis=0)       # (T, B, E)
    E = emb_tm.shape[-1]
    # Pad batch to a multiple of 8 -> sublane-aligned per-step row windows.
    Bp = ((B + 7) // 8) * 8
    emb_tm = jnp.pad(emb_tm, ((0, 0), (0, Bp - B), (0, 0)))
    x_flat = emb_tm.reshape(T * Bp, E).astype(jnp.bfloat16)        # row t*Bp + b
    # dropout -> identity (inference)

    layer_ws = [
        (params[f"wih_{l}"], params[f"whh_{l}"], params[f"b_{l}"])
        for l in range(n_layers)
    ]
    logits_flat = fused_ner_kernel(
        x_flat, layer_ws, params["w_fc_t"], params["b_fc"],
        T=T, Bp=Bp)                                                # (T*Bp, Op)

    Op = logits_flat.shape[-1]
    # Strip batch/output padding, tiny final re-layout to batch-first.
    logits = logits_flat.reshape(T, Bp, Op)[:, :B, :output_dim]
    return logits.transpose(1, 0, 2)                               # (B, T, O)


if __name__ == "__main__":
    # Small, forward-consistent shapes.
    vocab_size = 50
    embedding_dim = 32
    hidden_dim = 32
    output_dim = 8
    n_layers = 2
    batch = 2
    seq = 8

    key = jax.random.PRNGKey(0)
    k_tok, k_par = jax.random.split(key)

    tokens = jax.random.randint(k_tok, (batch, seq), 0, vocab_size,
                                dtype=jnp.int32)
    params = init_params(k_par, vocab_size, embedding_dim, hidden_dim,
                         output_dim, n_layers)

    logits = ner_forward(tokens, params, n_layers, output_dim)
    logits = jax.block_until_ready(logits)

    assert logits.shape == (batch, seq, output_dim), logits.shape
    assert logits.dtype == jnp.float32
    assert bool(jnp.all(jnp.isfinite(logits)))
    print("KERNEL_OK")
</pallas_src>

<mosaic_0001>
module attributes {stable_mosaic.version = 11 : i64} {
  func.func @kernel(%arg0: i32, %arg1: memref<64x32xbf16, #tpu.memory_space<vmem>>, %arg2: memref<32x128xbf16, #tpu.memory_space<vmem>>, %arg3: memref<32x128xbf16, #tpu.memory_space<vmem>>, %arg4: memref<1x128xf32, #tpu.memory_space<vmem>>, %arg5: memref<32x128xbf16, #tpu.memory_space<vmem>>, %arg6: memref<32x128xbf16, #tpu.memory_space<vmem>>, %arg7: memref<1x128xf32, #tpu.memory_space<vmem>>, %arg8: memref<32x128xbf16, #tpu.memory_space<vmem>>, %arg9: memref<1x128xf32, #tpu.memory_space<vmem>>, %arg10: memref<64x128xf32, #tpu.memory_space<vmem>>, %arg11: memref<64x32xf32, #tpu.memory_space<vmem>>, %arg12: memref<64x128xf32, #tpu.memory_space<vmem>>) attributes {dimension_semantics = [#tpu.dimension_semantics<arbitrary>], iteration_bounds = array<i64: 1>, scalar_prefetch = 0 : i64, scratch_operands = 2 : i64, tpu.core_type = #tpu.core_type<tc>, window_params = [{pipeline_mode = #tpu.pipeline_mode<synchronous>, transform_indices = @transform_0, window_bounds = array<i64: 64, 32>}, {pipeline_mode = #tpu.pipeline_mode<synchronous>, transform_indices = @transform_1, window_bounds = array<i64: 32, 128>}, {pipeline_mode = #tpu.pipeline_mode<synchronous>, transform_indices = @transform_2, window_bounds = array<i64: 32, 128>}, {pipeline_mode = #tpu.pipeline_mode<synchronous>, transform_indices = @transform_3, window_bounds = array<i64: 1, 128>}, {pipeline_mode = #tpu.pipeline_mode<synchronous>, transform_indices = @transform_4, window_bounds = array<i64: 32, 128>}, {pipeline_mode = #tpu.pipeline_mode<synchronous>, transform_indices = @transform_5, window_bounds = array<i64: 32, 128>}, {pipeline_mode = #tpu.pipeline_mode<synchronous>, transform_indices = @transform_6, window_bounds = array<i64: 1, 128>}, {pipeline_mode = #tpu.pipeline_mode<synchronous>, transform_indices = @transform_7, window_bounds = array<i64: 32, 128>}, {pipeline_mode = #tpu.pipeline_mode<synchronous>, transform_indices = @transform_8, window_bounds = array<i64: 1, 128>}, {pipeline_mode = #tpu.pipeline_mode<synchronous>, transform_indices = @transform_9, window_bounds = array<i64: 64, 128>}]} {
    %c0 = arith.constant 0 : index
    %c0_0 = arith.constant 0 : index
    %0 = vector.load %arg1[%c0, %c0_0] : memref<64x32xbf16, #tpu.memory_space<vmem>>, vector<64x32xbf16>
    %c0_1 = arith.constant 0 : index
    %c0_2 = arith.constant 0 : index
    %1 = vector.load %arg2[%c0_1, %c0_2] : memref<32x128xbf16, #tpu.memory_space<vmem>>, vector<32x128xbf16>
    %cst = arith.constant dense<0.000000e+00> : vector<64x128xf32>
    %2 = tpu.matmul %0, %1, %cst {dimension_numbers = #tpu.dot_dimension_numbers<[1], [0], [0], [1], [0, 0, 1, 1], [], []>} : vector<64x32xbf16>, vector<32x128xbf16>, vector<64x128xf32> -> vector<64x128xf32>
    %c0_3 = arith.constant 0 : index
    %c0_4 = arith.constant 0 : index
    %3 = vector.load %arg4[%c0_3, %c0_4] : memref<1x128xf32, #tpu.memory_space<vmem>>, vector<1x128xf32>
    %4 = vector.broadcast %3 : vector<1x128xf32> to vector<64x128xf32>
    %5 = arith.addf %2, %4 : vector<64x128xf32>
    %c0_5 = arith.constant 0 : index
    %c0_6 = arith.constant 0 : index
    %6 = vector.load %arg12[%c0_5, %c0_6] : memref<64x128xf32, #tpu.memory_space<vmem>>, vector<64x128xf32>
    tpu.vector_store %arg12[%c0_5, %c0_6], %5 {strides = array<i32>} : memref<64x128xf32, #tpu.memory_space<vmem>>, vector<64x128xf32>,
    %c0_7 = arith.constant 0 : index
    %c0_8 = arith.constant 0 : index
    %7 = vector.load %arg3[%c0_7, %c0_8] : memref<32x128xbf16, #tpu.memory_space<vmem>>, vector<32x128xbf16>
    %cst_9 = arith.constant 0.000000e+00 : f32
    %8 = vector.broadcast %cst_9 : f32 to vector<8x32xf32>
    %cst_10 = arith.constant 0.000000e+00 : f32
    %9 = vector.broadcast %cst_10 : f32 to vector<8x32xf32>
    %c0_11 = arith.constant 0 : index
    %c0_12 = arith.constant 0 : index
    %10 = vector.load %arg12[%c0_11, %c0_12] : memref<64x128xf32, #tpu.memory_space<vmem>>, vector<8x128xf32>
    %11 = arith.truncf %8 : vector<8x32xf32> to vector<8x32xbf16>
    %cst_13 = arith.constant dense<0.000000e+00> : vector<8x128xf32>
    %12 = tpu.matmul %11, %7, %cst_13 {dimension_numbers = #tpu.dot_dimension_numbers<[1], [0], [0], [1], [0, 0, 1, 1], [], []>} : vector<8x32xbf16>, vector<32x128xbf16>, vector<8x128xf32> -> vector<8x128xf32>
    %13 = arith.addf %10, %12 : vector<8x128xf32>
    %14 = vector.extract_strided_slice %13 {offsets = [0, 0], sizes = [8, 32], strides = [1, 1]} : vector<8x128xf32> to vector<8x32xf32>
    %15 = arith.negf %14 : vector<8x32xf32>
    %16 = math.exp %15 : vector<8x32xf32>
    %cst_14 = arith.constant 1.000000e+00 : f32
    %17 = vector.broadcast %cst_14 : f32 to vector<8x32xf32>
    %18 = arith.addf %17, %16 : vector<8x32xf32>
    %19 = arith.divf %17, %18 : vector<8x32xf32>
    %20 = vector.extract_strided_slice %13 {offsets = [0, 32], sizes = [8, 32], strides = [1, 1]} : vector<8x128xf32> to vector<8x32xf32>
    %21 = arith.negf %20 : vector<8x32xf32>
    %22 = math.exp %21 : vector<8x32xf32>
    %cst_15 = arith.constant 1.000000e+00 : f32
    %23 = vector.broadcast %cst_15 : f32 to vector<8x32xf32>
    %24 = arith.addf %23, %22 : vector<8x32xf32>
    %25 = arith.divf %23, %24 : vector<8x32xf32>
    %26 = vector.extract_strided_slice %13 {offsets = [0, 64], sizes = [8, 32], strides = [1, 1]} : vector<8x128xf32> to vector<8x32xf32>
    %27 = math.tanh %26 : vector<8x32xf32>
    %28 = vector.extract_strided_slice %13 {offsets = [0, 96], sizes = [8, 32], strides = [1, 1]} : vector<8x128xf32> to vector<8x32xf32>
    %29 = arith.negf %28 : vector<8x32xf32>
    %30 = math.exp %29 : vector<8x32xf32>
    %cst_16 = arith.constant 1.000000e+00 : f32
    %31 = vector.broadcast %cst_16 : f32 to vector<8x32xf32>
    %32 = arith.addf %31, %30 : vector<8x32xf32>
    %33 = arith.divf %31, %32 : vector<8x32xf32>
    %34 = arith.mulf %25, %9 : vector<8x32xf32>
    %35 = arith.mulf %19, %27 : vector<8x32xf32>
    %36 = arith.addf %34, %35 : vector<8x32xf32>
    %37 = math.tanh %36 : vector<8x32xf32>
    %38 = arith.mulf %33, %37 : vector<8x32xf32>
    %c0_17 = arith.constant 0 : index
    %c0_18 = arith.constant 0 : index
    %39 = vector.load %arg11[%c0_17, %c0_18] : memref<64x32xf32, #tpu.memory_space<vmem>>, vector<8x32xf32>
    tpu.vector_store %arg11[%c0_17, %c0_18], %38 {strides = array<i32>} : memref<64x32xf32, #tpu.memory_space<vmem>>, vector<8x32xf32>,
    %c8 = arith.constant 8 : index
    %c0_19 = arith.constant 0 : index
    %40 = vector.load %arg12[%c8, %c0_19] : memref<64x128xf32, #tpu.memory_space<vmem>>, vector<8x128xf32>
    %41 = arith.truncf %38 : vector<8x32xf32> to vector<8x32xbf16>
    %cst_20 = arith.constant dense<0.000000e+00> : vector<8x128xf32>
    %42 = tpu.matmul %41, %7, %cst_20 {dimension_numbers = #tpu.dot_dimension_numbers<[1], [0], [0], [1], [0, 0, 1, 1], [], []>} : vector<8x32xbf16>, vector<32x128xbf16>, vector<8x128xf32> -> vector<8x128xf32>
    %43 = arith.addf %40, %42 : vector<8x128xf32>
    %44 = vector.extract_strided_slice %43 {offsets = [0, 0], sizes = [8, 32], strides = [1, 1]} : vector<8x128xf32> to vector<8x32xf32>
    %45 = arith.negf %44 : vector<8x32xf32>
    %46 = math.exp %45 : vector<8x32xf32>
    %cst_21 = arith.constant 1.000000e+00 : f32
    %47 = vector.broadcast %cst_21 : f32 to vector<8x32xf32>
    %48 = arith.addf %47, %46 : vector<8x32xf32>
    %49 = arith.divf %47, %48 : vector<8x32xf32>
    %50 = vector.extract_strided_slice %43 {offsets = [0, 32], sizes = [8, 32], strides = [1, 1]} : vector<8x128xf32> to vector<8x32xf32>
    %51 = arith.negf %50 : vector<8x32xf32>
    %52 = math.exp %51 : vector<8x32xf32>
    %cst_22 = arith.constant 1.000000e+00 : f32
    %53 = vector.broadcast %cst_22 : f32 to vector<8x32xf32>
    %54 = arith.addf %53, %52 : vector<8x32xf32>
    %55 = arith.divf %53, %54 : vector<8x32xf32>
    %56 = vector.extract_strided_slice %43 {offsets = [0, 64], sizes = [8, 32], strides = [1, 1]} : vector<8x128xf32> to vector<8x32xf32>
    %57 = math.tanh %56 : vector<8x32xf32>
    %58 = vector.extract_strided_slice %43 {offsets = [0, 96], sizes = [8, 32], strides = [1, 1]} : vector<8x128xf32> to vector<8x32xf32>
    %59 = arith.negf %58 : vector<8x32xf32>
    %60 = math.exp %59 : vector<8x32xf32>
    %cst_23 = arith.constant 1.000000e+00 : f32
    %61 = vector.broadcast %cst_23 : f32 to vector<8x32xf32>
    %62 = arith.addf %61, %60 : vector<8x32xf32>
    %63 = arith.divf %61, %62 : vector<8x32xf32>
    %64 = arith.mulf %55, %36 : vector<8x32xf32>
    %65 = arith.mulf %49, %57 : vector<8x32xf32>
    %66 = arith.addf %64, %65 : vector<8x32xf32>
    %67 = math.tanh %66 : vector<8x32xf32>
    %68 = arith.mulf %63, %67 : vector<8x32xf32>
    %c8_24 = arith.constant 8 : index
    %c0_25 = arith.constant 0 : index
    %69 = vector.load %arg11[%c8_24, %c0_25] : memref<64x32xf32, #tpu.memory_space<vmem>>, vector<8x32xf32>
    tpu.vector_store %arg11[%c8_24, %c0_25], %68 {strides = array<i32>} : memref<64x32xf32, #tpu.memory_space<vmem>>, vector<8x32xf32>,
    %c16 = arith.constant 16 : index
    %c0_26 = arith.constant 0 : index
    %70 = vector.load %arg12[%c16, %c0_26] : memref<64x128xf32, #tpu.memory_space<vmem>>, vector<8x128xf32>
    %71 = arith.truncf %68 : vector<8x32xf32> to vector<8x32xbf16>
    %cst_27 = arith.constant dense<0.000000e+00> : vector<8x128xf32>
    %72 = tpu.matmul %71, %7, %cst_27 {dimension_numbers = #tpu.dot_dimension_numbers<[1], [0], [0], [1], [0, 0, 1, 1], [], []>} : vector<8x32xbf16>, vector<32x128xbf16>, vector<8x128xf32> -> vector<8x128xf32>
    %73 = arith.addf %70, %72 : vector<8x128xf32>
    %74 = vector.extract_strided_slice %73 {offsets = [0, 0], sizes = [8, 32], strides = [1, 1]} : vector<8x128xf32> to vector<8x32xf32>
    %75 = arith.negf %74 : vector<8x32xf32>
    %76 = math.exp %75 : vector<8x32xf32>
    %cst_28 = arith.constant 1.000000e+00 : f32
    %77 = vector.broadcast %cst_28 : f32 to vector<8x32xf32>
    %78 = arith.addf %77, %76 : vector<8x32xf32>
    %79 = arith.divf %77, %78 : vector<8x32xf32>
    %80 = vector.extract_strided_slice %73 {offsets = [0, 32], sizes = [8, 32], strides = [1, 1]} : vector<8x128xf32> to vector<8x32xf32>
    %81 = arith.negf %80 : vector<8x32xf32>
    %82 = math.exp %81 : vector<8x32xf32>
    %cst_29 = arith.constant 1.000000e+00 : f32
    %83 = vector.broadcast %cst_29 : f32 to vector<8x32xf32>
    %84 = arith.addf %83, %82 : vector<8x32xf32>
    %85 = arith.divf %83, %84 : vector<8x32xf32>
    %86 = vector.extract_strided_slice %73 {offsets = [0, 64], sizes = [8, 32], strides = [1, 1]} : vector<8x128xf32> to vector<8x32xf32>
    %87 = math.tanh %86 : vector<8x32xf32>
    %88 = vector.extract_strided_slice %73 {offsets = [0, 96], sizes = [8, 32], strides = [1, 1]} : vector<8x128xf32> to vector<8x32xf32>
    %89 = arith.negf %88 : vector<8x32xf32>
    %90 = math.exp %89 : vector<8x32xf32>
    %cst_30 = arith.constant 1.000000e+00 : f32
    %91 = vector.broadcast %cst_30 : f32 to vector<8x32xf32>
    %92 = arith.addf %91, %90 : vector<8x32xf32>
    %93 = arith.divf %91, %92 : vector<8x32xf32>
    %94 = arith.mulf %85, %66 : vector<8x32xf32>
    %95 = arith.mulf %79, %87 : vector<8x32xf32>
    %96 = arith.addf %94, %95 : vector<8x32xf32>
    %97 = math.tanh %96 : vector<8x32xf32>
    %98 = arith.mulf %93, %97 : vector<8x32xf32>
    %c16_31 = arith.constant 16 : index
    %c0_32 = arith.constant 0 : index
    %99 = vector.load %arg11[%c16_31, %c0_32] : memref<64x32xf32, #tpu.memory_space<vmem>>, vector<8x32xf32>
    tpu.vector_store %arg11[%c16_31, %c0_32], %98 {strides = array<i32>} : memref<64x32xf32, #tpu.memory_space<vmem>>, vector<8x32xf32>,
    %c24 = arith.constant 24 : index
    %c0_33 = arith.constant 0 : index
    %100 = vector.load %arg12[%c24, %c0_33] : memref<64x128xf32, #tpu.memory_space<vmem>>, vector<8x128xf32>
    %101 = arith.truncf %98 : vector<8x32xf32> to vector<8x32xbf16>
    %cst_34 = arith.constant dense<0.000000e+00> : vector<8x128xf32>
    %102 = tpu.matmul %101, %7, %cst_34 {dimension_numbers = #tpu.dot_dimension_numbers<[1], [0], [0], [1], [0, 0, 1, 1], [], []>} : vector<8x32xbf16>, vector<32x128xbf16>, vector<8x128xf32> -> vector<8x128xf32>
    %103 = arith.addf %100, %102 : vector<8x128xf32>
    %104 = vector.extract_strided_slice %103 {offsets = [0, 0], sizes = [8, 32], strides = [1, 1]} : vector<8x128xf32> to vector<8x32xf32>
    %105 = arith.negf %104 : vector<8x32xf32>
    %106 = math.exp %105 : vector<8x32xf32>
    %cst_35 = arith.constant 1.000000e+00 : f32
    %107 = vector.broadcast %cst_35 : f32 to vector<8x32xf32>
    %108 = arith.addf %107, %106 : vector<8x32xf32>
    %109 = arith.divf %107, %108 : vector<8x32xf32>
    %110 = vector.extract_strided_slice %103 {offsets = [0, 32], sizes = [8, 32], strides = [1, 1]} : vector<8x128xf32> to vector<8x32xf32>
    %111 = arith.negf %110 : vector<8x32xf32>
    %112 = math.exp %111 : vector<8x32xf32>
    %cst_36 = arith.constant 1.000000e+00 : f32
    %113 = vector.broadcast %cst_36 : f32 to vector<8x32xf32>
    %114 = arith.addf %113, %112 : vector<8x32xf32>
    %115 = arith.divf %113, %114 : vector<8x32xf32>
    %116 = vector.extract_strided_slice %103 {offsets = [0, 64], sizes = [8, 32], strides = [1, 1]} : vector<8x128xf32> to vector<8x32xf32>
    %117 = math.tanh %116 : vector<8x32xf32>
    %118 = vector.extract_strided_slice %103 {offsets = [0, 96], sizes = [8, 32], strides = [1, 1]} : vector<8x128xf32> to vector<8x32xf32>
    %119 = arith.negf %118 : vector<8x32xf32>
    %120 = math.exp %119 : vector<8x32xf32>
    %cst_37 = arith.constant 1.000000e+00 : f32
    %121 = vector.broadcast %cst_37 : f32 to vector<8x32xf32>
    %122 = arith.addf %121, %120 : vector<8x32xf32>
    %123 = arith.divf %121, %122 : vector<8x32xf32>
    %124 = arith.mulf %115, %96 : vector<8x32xf32>
    %125 = arith.mulf %109, %117 : vector<8x32xf32>
    %126 = arith.addf %124, %125 : vector<8x32xf32>
    %127 = math.tanh %126 : vector<8x32xf32>
    %128 = arith.mulf %123, %127 : vector<8x32xf32>
    %c24_38 = arith.constant 24 : index
    %c0_39 = arith.constant 0 : index
    %129 = vector.load %arg11[%c24_38, %c0_39] : memref<64x32xf32, #tpu.memory_space<vmem>>, vector<8x32xf32>
    tpu.vector_store %arg11[%c24_38, %c0_39], %128 {strides = array<i32>} : memref<64x32xf32, #tpu.memory_space<vmem>>, vector<8x32xf32>,
    %c32 = arith.constant 32 : index
    %c0_40 = arith.constant 0 : index
    %130 = vector.load %arg12[%c32, %c0_40] : memref<64x128xf32, #tpu.memory_space<vmem>>, vector<8x128xf32>
    %131 = arith.truncf %128 : vector<8x32xf32> to vector<8x32xbf16>
    %cst_41 = arith.constant dense<0.000000e+00> : vector<8x128xf32>
    %132 = tpu.matmul %131, %7, %cst_41 {dimension_numbers = #tpu.dot_dimension_numbers<[1], [0], [0], [1], [0, 0, 1, 1], [], []>} : vector<8x32xbf16>, vector<32x128xbf16>, vector<8x128xf32> -> vector<8x128xf32>
    %133 = arith.addf %130, %132 : vector<8x128xf32>
    %134 = vector.extract_strided_slice %133 {offsets = [0, 0], sizes = [8, 32], strides = [1, 1]} : vector<8x128xf32> to vector<8x32xf32>
    %135 = arith.negf %134 : vector<8x32xf32>
    %136 = math.exp %135 : vector<8x32xf32>
    %cst_42 = arith.constant 1.000000e+00 : f32
    %137 = vector.broadcast %cst_42 : f32 to vector<8x32xf32>
    %138 = arith.addf %137, %136 : vector<8x32xf32>
    %139 = arith.divf %137, %138 : vector<8x32xf32>
    %140 = vector.extract_strided_slice %133 {offsets = [0, 32], sizes = [8, 32], strides = [1, 1]} : vector<8x128xf32> to vector<8x32xf32>
    %141 = arith.negf %140 : vector<8x32xf32>
    %142 = math.exp %141 : vector<8x32xf32>
    %cst_43 = arith.constant 1.000000e+00 : f32
    %143 = vector.broadcast %cst_43 : f32 to vector<8x32xf32>
    %144 = arith.addf %143, %142 : vector<8x32xf32>
    %145 = arith.divf %143, %144 : vector<8x32xf32>
    %146 = vector.extract_strided_slice %133 {offsets = [0, 64], sizes = [8, 32], strides = [1, 1]} : vector<8x128xf32> to vector<8x32xf32>
    %147 = math.tanh %146 : vector<8x32xf32>
    %148 = vector.extract_strided_slice %133 {offsets = [0, 96], sizes = [8, 32], strides = [1, 1]} : vector<8x128xf32> to vector<8x32xf32>
    %149 = arith.negf %148 : vector<8x32xf32>
    %150 = math.exp %149 : vector<8x32xf32>
    %cst_44 = arith.constant 1.000000e+00 : f32
    %151 = vector.broadcast %cst_44 : f32 to vector<8x32xf32>
    %152 = arith.addf %151, %150 : vector<8x32xf32>
    %153 = arith.divf %151, %152 : vector<8x32xf32>
    %154 = arith.mulf %145, %126 : vector<8x32xf32>
    %155 = arith.mulf %139, %147 : vector<8x32xf32>
    %156 = arith.addf %154, %155 : vector<8x32xf32>
    %157 = math.tanh %156 : vector<8x32xf32>
    %158 = arith.mulf %153, %157 : vector<8x32xf32>
    %c32_45 = arith.constant 32 : index
    %c0_46 = arith.constant 0 : index
    %159 = vector.load %arg11[%c32_45, %c0_46] : memref<64x32xf32, #tpu.memory_space<vmem>>, vector<8x32xf32>
    tpu.vector_store %arg11[%c32_45, %c0_46], %158 {strides = array<i32>} : memref<64x32xf32, #tpu.memory_space<vmem>>, vector<8x32xf32>,
    %c40 = arith.constant 40 : index
    %c0_47 = arith.constant 0 : index
    %160 = vector.load %arg12[%c40, %c0_47] : memref<64x128xf32, #tpu.memory_space<vmem>>, vector<8x128xf32>
    %161 = arith.truncf %158 : vector<8x32xf32> to vector<8x32xbf16>
    %cst_48 = arith.constant dense<0.000000e+00> : vector<8x128xf32>
    %162 = tpu.matmul %161, %7, %cst_48 {dimension_numbers = #tpu.dot_dimension_numbers<[1], [0], [0], [1], [0, 0, 1, 1], [], []>} : vector<8x32xbf16>, vector<32x128xbf16>, vector<8x128xf32> -> vector<8x128xf32>
    %163 = arith.addf %160, %162 : vector<8x128xf32>
    %164 = vector.extract_strided_slice %163 {offsets = [0, 0], sizes = [8, 32], strides = [1, 1]} : vector<8x128xf32> to vector<8x32xf32>
    %165 = arith.negf %164 : vector<8x32xf32>
    %166 = math.exp %165 : vector<8x32xf32>
    %cst_49 = arith.constant 1.000000e+00 : f32
    %167 = vector.broadcast %cst_49 : f32 to vector<8x32xf32>
    %168 = arith.addf %167, %166 : vector<8x32xf32>
    %169 = arith.divf %167, %168 : vector<8x32xf32>
    %170 = vector.extract_strided_slice %163 {offsets = [0, 32], sizes = [8, 32], strides = [1, 1]} : vector<8x128xf32> to vector<8x32xf32>
    %171 = arith.negf %170 : vector<8x32xf32>
    %172 = math.exp %171 : vector<8x32xf32>
    %cst_50 = arith.constant 1.000000e+00 : f32
    %173 = vector.broadcast %cst_50 : f32 to vector<8x32xf32>
    %174 = arith.addf %173, %172 : vector<8x32xf32>
    %175 = arith.divf %173, %174 : vector<8x32xf32>
    %176 = vector.extract_strided_slice %163 {offsets = [0, 64], sizes = [8, 32], strides = [1, 1]} : vector<8x128xf32> to vector<8x32xf32>
    %177 = math.tanh %176 : vector<8x32xf32>
    %178 = vector.extract_strided_slice %163 {offsets = [0, 96], sizes = [8, 32], strides = [1, 1]} : vector<8x128xf32> to vector<8x32xf32>
    %179 = arith.negf %178 : vector<8x32xf32>
    %180 = math.exp %179 : vector<8x32xf32>
    %cst_51 = arith.constant 1.000000e+00 : f32
    %181 = vector.broadcast %cst_51 : f32 to vector<8x32xf32>
    %182 = arith.addf %181, %180 : vector<8x32xf32>
    %183 = arith.divf %181, %182 : vector<8x32xf32>
    %184 = arith.mulf %175, %156 : vector<8x32xf32>
    %185 = arith.mulf %169, %177 : vector<8x32xf32>
    %186 = arith.addf %184, %185 : vector<8x32xf32>
    %187 = math.tanh %186 : vector<8x32xf32>
    %188 = arith.mulf %183, %187 : vector<8x32xf32>
    %c40_52 = arith.constant 40 : index
    %c0_53 = arith.constant 0 : index
    %189 = vector.load %arg11[%c40_52, %c0_53] : memref<64x32xf32, #tpu.memory_space<vmem>>, vector<8x32xf32>
    tpu.vector_store %arg11[%c40_52, %c0_53], %188 {strides = array<i32>} : memref<64x32xf32, #tpu.memory_space<vmem>>, vector<8x32xf32>,
    %c48 = arith.constant 48 : index
    %c0_54 = arith.constant 0 : index
    %190 = vector.load %arg12[%c48, %c0_54] : memref<64x128xf32, #tpu.memory_space<vmem>>, vector<8x128xf32>
    %191 = arith.truncf %188 : vector<8x32xf32> to vector<8x32xbf16>
    %cst_55 = arith.constant dense<0.000000e+00> : vector<8x128xf32>
    %192 = tpu.matmul %191, %7, %cst_55 {dimension_numbers = #tpu.dot_dimension_numbers<[1], [0], [0], [1], [0, 0, 1, 1], [], []>} : vector<8x32xbf16>, vector<32x128xbf16>, vector<8x128xf32> -> vector<8x128xf32>
    %193 = arith.addf %190, %192 : vector<8x128xf32>
    %194 = vector.extract_strided_slice %193 {offsets = [0, 0], sizes = [8, 32], strides = [1, 1]} : vector<8x128xf32> to vector<8x32xf32>
    %195 = arith.negf %194 : vector<8x32xf32>
    %196 = math.exp %195 : vector<8x32xf32>
    %cst_56 = arith.constant 1.000000e+00 : f32
    %197 = vector.broadcast %cst_56 : f32 to vector<8x32xf32>
    %198 = arith.addf %197, %196 : vector<8x32xf32>
    %199 = arith.divf %197, %198 : vector<8x32xf32>
    %200 = vector.extract_strided_slice %193 {offsets = [0, 32], sizes = [8, 32], strides = [1, 1]} : vector<8x128xf32> to vector<8x32xf32>
    %201 = arith.negf %200 : vector<8x32xf32>
    %202 = math.exp %201 : vector<8x32xf32>
    %cst_57 = arith.constant 1.000000e+00 : f32
    %203 = vector.broadcast %cst_57 : f32 to vector<8x32xf32>
    %204 = arith.addf %203, %202 : vector<8x32xf32>
    %205 = arith.divf %203, %204 : vector<8x32xf32>
    %206 = vector.extract_strided_slice %193 {offsets = [0, 64], sizes = [8, 32], strides = [1, 1]} : vector<8x128xf32> to vector<8x32xf32>
    %207 = math.tanh %206 : vector<8x32xf32>
    %208 = vector.extract_strided_slice %193 {offsets = [0, 96], sizes = [8, 32], strides = [1, 1]} : vector<8x128xf32> to vector<8x32xf32>
    %209 = arith.negf %208 : vector<8x32xf32>
    %210 = math.exp %209 : vector<8x32xf32>
    %cst_58 = arith.constant 1.000000e+00 : f32
    %211 = vector.broadcast %cst_58 : f32 to vector<8x32xf32>
    %212 = arith.addf %211, %210 : vector<8x32xf32>
    %213 = arith.divf %211, %212 : vector<8x32xf32>
    %214 = arith.mulf %205, %186 : vector<8x32xf32>
    %215 = arith.mulf %199, %207 : vector<8x32xf32>
    %216 = arith.addf %214, %215 : vector<8x32xf32>
    %217 = math.tanh %216 : vector<8x32xf32>
    %218 = arith.mulf %213, %217 : vector<8x32xf32>
    %c48_59 = arith.constant 48 : index
    %c0_60 = arith.constant 0 : index
    %219 = vector.load %arg11[%c48_59, %c0_60] : memref<64x32xf32, #tpu.memory_space<vmem>>, vector<8x32xf32>
    tpu.vector_store %arg11[%c48_59, %c0_60], %218 {strides = array<i32>} : memref<64x32xf32, #tpu.memory_space<vmem>>, vector<8x32xf32>,
    %c56 = arith.constant 56 : index
    %c0_61 = arith.constant 0 : index
    %220 = vector.load %arg12[%c56, %c0_61] : memref<64x128xf32, #tpu.memory_space<vmem>>, vector<8x128xf32>
    %221 = arith.truncf %218 : vector<8x32xf32> to vector<8x32xbf16>
    %cst_62 = arith.constant dense<0.000000e+00> : vector<8x128xf32>
    %222 = tpu.matmul %221, %7, %cst_62 {dimension_numbers = #tpu.dot_dimension_numbers<[1], [0], [0], [1], [0, 0, 1, 1], [], []>} : vector<8x32xbf16>, vector<32x128xbf16>, vector<8x128xf32> -> vector<8x128xf32>
    %223 = arith.addf %220, %222 : vector<8x128xf32>
    %224 = vector.extract_strided_slice %223 {offsets = [0, 0], sizes = [8, 32], strides = [1, 1]} : vector<8x128xf32> to vector<8x32xf32>
    %225 = arith.negf %224 : vector<8x32xf32>
    %226 = math.exp %225 : vector<8x32xf32>
    %cst_63 = arith.constant 1.000000e+00 : f32
    %227 = vector.broadcast %cst_63 : f32 to vector<8x32xf32>
    %228 = arith.addf %227, %226 : vector<8x32xf32>
    %229 = arith.divf %227, %228 : vector<8x32xf32>
    %230 = vector.extract_strided_slice %223 {offsets = [0, 32], sizes = [8, 32], strides = [1, 1]} : vector<8x128xf32> to vector<8x32xf32>
    %231 = arith.negf %230 : vector<8x32xf32>
    %232 = math.exp %231 : vector<8x32xf32>
    %cst_64 = arith.constant 1.000000e+00 : f32
    %233 = vector.broadcast %cst_64 : f32 to vector<8x32xf32>
    %234 = arith.addf %233, %232 : vector<8x32xf32>
    %235 = arith.divf %233, %234 : vector<8x32xf32>
    %236 = vector.extract_strided_slice %223 {offsets = [0, 64], sizes = [8, 32], strides = [1, 1]} : vector<8x128xf32> to vector<8x32xf32>
    %237 = math.tanh %236 : vector<8x32xf32>
    %238 = vector.extract_strided_slice %223 {offsets = [0, 96], sizes = [8, 32], strides = [1, 1]} : vector<8x128xf32> to vector<8x32xf32>
    %239 = arith.negf %238 : vector<8x32xf32>
    %240 = math.exp %239 : vector<8x32xf32>
    %cst_65 = arith.constant 1.000000e+00 : f32
    %241 = vector.broadcast %cst_65 : f32 to vector<8x32xf32>
    %242 = arith.addf %241, %240 : vector<8x32xf32>
    %243 = arith.divf %241, %242 : vector<8x32xf32>
    %244 = arith.mulf %235, %216 : vector<8x32xf32>
    %245 = arith.mulf %229, %237 : vector<8x32xf32>
    %246 = arith.addf %244, %245 : vector<8x32xf32>
    %247 = math.tanh %246 : vector<8x32xf32>
    %248 = arith.mulf %243, %247 : vector<8x32xf32>
    %c56_66 = arith.constant 56 : index
    %c0_67 = arith.constant 0 : index
    %249 = vector.load %arg11[%c56_66, %c0_67] : memref<64x32xf32, #tpu.memory_space<vmem>>, vector<8x32xf32>
    tpu.vector_store %arg11[%c56_66, %c0_67], %248 {strides = array<i32>} : memref<64x32xf32, #tpu.memory_space<vmem>>, vector<8x32xf32>,
    %c0_68 = arith.constant 0 : index
    %c0_69 = arith.constant 0 : index
    %250 = vector.load %arg11[%c0_68, %c0_69] : memref<64x32xf32, #tpu.memory_space<vmem>>, vector<64x32xf32>
    %251 = arith.truncf %250 : vector<64x32xf32> to vector<64x32xbf16>
    %c0_70 = arith.constant 0 : index
    %c0_71 = arith.constant 0 : index
    %252 = vector.load %arg5[%c0_70, %c0_71] : memref<32x128xbf16, #tpu.memory_space<vmem>>, vector<32x128xbf16>
    %cst_72 = arith.constant dense<0.000000e+00> : vector<64x128xf32>
    %253 = tpu.matmul %251, %252, %cst_72 {dimension_numbers = #tpu.dot_dimension_numbers<[1], [0], [0], [1], [0, 0, 1, 1], [], []>} : vector<64x32xbf16>, vector<32x128xbf16>, vector<64x128xf32> -> vector<64x128xf32>
    %c0_73 = arith.constant 0 : index
    %c0_74 = arith.constant 0 : index
    %254 = vector.load %arg7[%c0_73, %c0_74] : memref<1x128xf32, #tpu.memory_space<vmem>>, vector<1x128xf32>
    %255 = vector.broadcast %254 : vector<1x128xf32> to vector<64x128xf32>
    %256 = arith.addf %253, %255 : vector<64x128xf32>
    %c0_75 = arith.constant 0 : index
    %c0_76 = arith.constant 0 : index
    %257 = vector.load %arg12[%c0_75, %c0_76] : memref<64x128xf32, #tpu.memory_space<vmem>>, vector<64x128xf32>
    tpu.vector_store %arg12[%c0_75, %c0_76], %256 {strides = array<i32>} : memref<64x128xf32, #tpu.memory_space<vmem>>, vector<64x128xf32>,
    %c0_77 = arith.constant 0 : index
    %c0_78 = arith.constant 0 : index
    %258 = vector.load %arg6[%c0_77, %c0_78] : memref<32x128xbf16, #tpu.memory_space<vmem>>, vector<32x128xbf16>
    %cst_79 = arith.constant 0.000000e+00 : f32
    %259 = vector.broadcast %cst_79 : f32 to vector<8x32xf32>
    %cst_80 = arith.constant 0.000000e+00 : f32
    %260 = vector.broadcast %cst_80 : f32 to vector<8x32xf32>
    %c0_81 = arith.constant 0 : index
    %c0_82 = arith.constant 0 : index
    %261 = vector.load %arg12[%c0_81, %c0_82] : memref<64x128xf32, #tpu.memory_space<vmem>>, vector<8x128xf32>
    %262 = arith.truncf %259 : vector<8x32xf32> to vector<8x32xbf16>
    %cst_83 = arith.constant dense<0.000000e+00> : vector<8x128xf32>
    %263 = tpu.matmul %262, %258, %cst_83 {dimension_numbers = #tpu.dot_dimension_numbers<[1], [0], [0], [1], [0, 0, 1, 1], [], []>} : vector<8x32xbf16>, vector<32x128xbf16>, vector<8x128xf32> -> vector<8x128xf32>
    %264 = arith.addf %261, %263 : vector<8x128xf32>
    %265 = vector.extract_strided_slice %264 {offsets = [0, 0], sizes = [8, 32], strides = [1, 1]} : vector<8x128xf32> to vector<8x32xf32>
    %266 = arith.negf %265 : vector<8x32xf32>
    %267 = math.exp %266 : vector<8x32xf32>
    %cst_84 = arith.constant 1.000000e+00 : f32
    %268 = vector.broadcast %cst_84 : f32 to vector<8x32xf32>
    %269 = arith.addf %268, %267 : vector<8x32xf32>
    %270 = arith.divf %268, %269 : vector<8x32xf32>
    %271 = vector.extract_strided_slice %264 {offsets = [0, 32], sizes = [8, 32], strides = [1, 1]} : vector<8x128xf32> to vector<8x32xf32>
    %272 = arith.negf %271 : vector<8x32xf32>
    %273 = math.exp %272 : vector<8x32xf32>
    %cst_85 = arith.constant 1.000000e+00 : f32
    %274 = vector.broadcast %cst_85 : f32 to vector<8x32xf32>
    %275 = arith.addf %274, %273 : vector<8x32xf32>
    %276 = arith.divf %274, %275 : vector<8x32xf32>
    %277 = vector.extract_strided_slice %264 {offsets = [0, 64], sizes = [8, 32], strides = [1, 1]} : vector<8x128xf32> to vector<8x32xf32>
    %278 = math.tanh %277 : vector<8x32xf32>
    %279 = vector.extract_strided_slice %264 {offsets = [0, 96], sizes = [8, 32], strides = [1, 1]} : vector<8x128xf32> to vector<8x32xf32>
    %280 = arith.negf %279 : vector<8x32xf32>
    %281 = math.exp %280 : vector<8x32xf32>
    %cst_86 = arith.constant 1.000000e+00 : f32
    %282 = vector.broadcast %cst_86 : f32 to vector<8x32xf32>
    %283 = arith.addf %282, %281 : vector<8x32xf32>
    %284 = arith.divf %282, %283 : vector<8x32xf32>
    %285 = arith.mulf %276, %260 : vector<8x32xf32>
    %286 = arith.mulf %270, %278 : vector<8x32xf32>
    %287 = arith.addf %285, %286 : vector<8x32xf32>
    %288 = math.tanh %287 : vector<8x32xf32>
    %289 = arith.mulf %284, %288 : vector<8x32xf32>
    %c0_87 = arith.constant 0 : index
    %c0_88 = arith.constant 0 : index
    %290 = vector.load %arg11[%c0_87, %c0_88] : memref<64x32xf32, #tpu.memory_space<vmem>>, vector<8x32xf32>
    tpu.vector_store %arg11[%c0_87, %c0_88], %289 {strides = array<i32>} : memref<64x32xf32, #tpu.memory_space<vmem>>, vector<8x32xf32>,
    %c8_89 = arith.constant 8 : index
    %c0_90 = arith.constant 0 : index
    %291 = vector.load %arg12[%c8_89, %c0_90] : memref<64x128xf32, #tpu.memory_space<vmem>>, vector<8x128xf32>
    %292 = arith.truncf %289 : vector<8x32xf32> to vector<8x32xbf16>
    %cst_91 = arith.constant dense<0.000000e+00> : vector<8x128xf32>
    %293 = tpu.matmul %292, %258, %cst_91 {dimension_numbers = #tpu.dot_dimension_numbers<[1], [0], [0], [1], [0, 0, 1, 1], [], []>} : vector<8x32xbf16>, vector<32x128xbf16>, vector<8x128xf32> -> vector<8x128xf32>
    %294 = arith.addf %291, %293 : vector<8x128xf32>
    %295 = vector.extract_strided_slice %294 {offsets = [0, 0], sizes = [8, 32], strides = [1, 1]} : vector<8x128xf32> to vector<8x32xf32>
    %296 = arith.negf %295 : vector<8x32xf32>
    %297 = math.exp %296 : vector<8x32xf32>
    %cst_92 = arith.constant 1.000000e+00 : f32
    %298 = vector.broadcast %cst_92 : f32 to vector<8x32xf32>
    %299 = arith.addf %298, %297 : vector<8x32xf32>
    %300 = arith.divf %298, %299 : vector<8x32xf32>
    %301 = vector.extract_strided_slice %294 {offsets = [0, 32], sizes = [8, 32], strides = [1, 1]} : vector<8x128xf32> to vector<8x32xf32>
    %302 = arith.negf %301 : vector<8x32xf32>
    %303 = math.exp %302 : vector<8x32xf32>
    %cst_93 = arith.constant 1.000000e+00 : f32
    %304 = vector.broadcast %cst_93 : f32 to vector<8x32xf32>
    %305 = arith.addf %304, %303 : vector<8x32xf32>
    %306 = arith.divf %304, %305 : vector<8x32xf32>
    %307 = vector.extract_strided_slice %294 {offsets = [0, 64], sizes = [8, 32], strides = [1, 1]} : vector<8x128xf32> to vector<8x32xf32>
    %308 = math.tanh %307 : vector<8x32xf32>
    %309 = vector.extract_strided_slice %294 {offsets = [0, 96], sizes = [8, 32], strides = [1, 1]} : vector<8x128xf32> to vector<8x32xf32>
    %310 = arith.negf %309 : vector<8x32xf32>
    %311 = math.exp %310 : vector<8x32xf32>
    %cst_94 = arith.constant 1.000000e+00 : f32
    %312 = vector.broadcast %cst_94 : f32 to vector<8x32xf32>
    %313 = arith.addf %312, %311 : vector<8x32xf32>
    %314 = arith.divf %312, %313 : vector<8x32xf32>
    %315 = arith.mulf %306, %287 : vector<8x32xf32>
    %316 = arith.mulf %300, %308 : vector<8x32xf32>
    %317 = arith.addf %315, %316 : vector<8x32xf32>
    %318 = math.tanh %317 : vector<8x32xf32>
    %319 = arith.mulf %314, %318 : vector<8x32xf32>
    %c8_95 = arith.constant 8 : index
    %c0_96 = arith.constant 0 : index
    %320 = vector.load %arg11[%c8_95, %c0_96] : memref<64x32xf32, #tpu.memory_space<vmem>>, vector<8x32xf32>
    tpu.vector_store %arg11[%c8_95, %c0_96], %319 {strides = array<i32>} : memref<64x32xf32, #tpu.memory_space<vmem>>, vector<8x32xf32>,
    %c16_97 = arith.constant 16 : index
    %c0_98 = arith.constant 0 : index
    %321 = vector.load %arg12[%c16_97, %c0_98] : memref<64x128xf32, #tpu.memory_space<vmem>>, vector<8x128xf32>
    %322 = arith.truncf %319 : vector<8x32xf32> to vector<8x32xbf16>
    %cst_99 = arith.constant dense<0.000000e+00> : vector<8x128xf32>
    %323 = tpu.matmul %322, %258, %cst_99 {dimension_numbers = #tpu.dot_dimension_numbers<[1], [0], [0], [1], [0, 0, 1, 1], [], []>} : vector<8x32xbf16>, vector<32x128xbf16>, vector<8x128xf32> -> vector<8x128xf32>
    %324 = arith.addf %321, %323 : vector<8x128xf32>
    %325 = vector.extract_strided_slice %324 {offsets = [0, 0], sizes = [8, 32], strides = [1, 1]} : vector<8x128xf32> to vector<8x32xf32>
    %326 = arith.negf %325 : vector<8x32xf32>
    %327 = math.exp %326 : vector<8x32xf32>
    %cst_100 = arith.constant 1.000000e+00 : f32
    %328 = vector.broadcast %cst_100 : f32 to vector<8x32xf32>
    %329 = arith.addf %328, %327 : vector<8x32xf32>
    %330 = arith.divf %328, %329 : vector<8x32xf32>
    %331 = vector.extract_strided_slice %324 {offsets = [0, 32], sizes = [8, 32], strides = [1, 1]} : vector<8x128xf32> to vector<8x32xf32>
    %332 = arith.negf %331 : vector<8x32xf32>
    %333 = math.exp %332 : vector<8x32xf32>
    %cst_101 = arith.constant 1.000000e+00 : f32
    %334 = vector.broadcast %cst_101 : f32 to vector<8x32xf32>
    %335 = arith.addf %334, %333 : vector<8x32xf32>
    %336 = arith.divf %334, %335 : vector<8x32xf32>
    %337 = vector.extract_strided_slice %324 {offsets = [0, 64], sizes = [8, 32], strides = [1, 1]} : vector<8x128xf32> to vector<8x32xf32>
    %338 = math.tanh %337 : vector<8x32xf32>
    %339 = vector.extract_strided_slice %324 {offsets = [0, 96], sizes = [8, 32], strides = [1, 1]} : vector<8x128xf32> to vector<8x32xf32>
    %340 = arith.negf %339 : vector<8x32xf32>
    %341 = math.exp %340 : vector<8x32xf32>
    %cst_102 = arith.constant 1.000000e+00 : f32
    %342 = vector.broadcast %cst_102 : f32 to vector<8x32xf32>
    %343 = arith.addf %342, %341 : vector<8x32xf32>
    %344 = arith.divf %342, %343 : vector<8x32xf32>
    %345 = arith.mulf %336, %317 : vector<8x32xf32>
    %346 = arith.mulf %330, %338 : vector<8x32xf32>
    %347 = arith.addf %345, %346 : vector<8x32xf32>
    %348 = math.tanh %347 : vector<8x32xf32>
    %349 = arith.mulf %344, %348 : vector<8x32xf32>
    %c16_103 = arith.constant 16 : index
    %c0_104 = arith.constant 0 : index
    %350 = vector.load %arg11[%c16_103, %c0_104] : memref<64x32xf32, #tpu.memory_space<vmem>>, vector<8x32xf32>
    tpu.vector_store %arg11[%c16_103, %c0_104], %349 {strides = array<i32>} : memref<64x32xf32, #tpu.memory_space<vmem>>, vector<8x32xf32>,
    %c24_105 = arith.constant 24 : index
    %c0_106 = arith.constant 0 : index
    %351 = vector.load %arg12[%c24_105, %c0_106] : memref<64x128xf32, #tpu.memory_space<vmem>>, vector<8x128xf32>
    %352 = arith.truncf %349 : vector<8x32xf32> to vector<8x32xbf16>
    %cst_107 = arith.constant dense<0.000000e+00> : vector<8x128xf32>
    %353 = tpu.matmul %352, %258, %cst_107 {dimension_numbers = #tpu.dot_dimension_numbers<[1], [0], [0], [1], [0, 0, 1, 1], [], []>} : vector<8x32xbf16>, vector<32x128xbf16>, vector<8x128xf32> -> vector<8x128xf32>
    %354 = arith.addf %351, %353 : vector<8x128xf32>
    %355 = vector.extract_strided_slice %354 {offsets = [0, 0], sizes = [8, 32], strides = [1, 1]} : vector<8x128xf32> to vector<8x32xf32>
    %356 = arith.negf %355 : vector<8x32xf32>
    %357 = math.exp %356 : vector<8x32xf32>
    %cst_108 = arith.constant 1.000000e+00 : f32
    %358 = vector.broadcast %cst_108 : f32 to vector<8x32xf32>
    %359 = arith.addf %358, %357 : vector<8x32xf32>
    %360 = arith.divf %358, %359 : vector<8x32xf32>
    %361 = vector.extract_strided_slice %354 {offsets = [0, 32], sizes = [8, 32], strides = [1, 1]} : vector<8x128xf32> to vector<8x32xf32>
    %362 = arith.negf %361 : vector<8x32xf32>
    %363 = math.exp %362 : vector<8x32xf32>
    %cst_109 = arith.constant 1.000000e+00 : f32
    %364 = vector.broadcast %cst_109 : f32 to vector<8x32xf32>
    %365 = arith.addf %364, %363 : vector<8x32xf32>
    %366 = arith.divf %364, %365 : vector<8x32xf32>
    %367 = vector.extract_strided_slice %354 {offsets = [0, 64], sizes = [8, 32], strides = [1, 1]} : vector<8x128xf32> to vector<8x32xf32>
    %368 = math.tanh %367 : vector<8x32xf32>
    %369 = vector.extract_strided_slice %354 {offsets = [0, 96], sizes = [8, 32], strides = [1, 1]} : vector<8x128xf32> to vector<8x32xf32>
    %370 = arith.negf %369 : vector<8x32xf32>
    %371 = math.exp %370 : vector<8x32xf32>
    %cst_110 = arith.constant 1.000000e+00 : f32
    %372 = vector.broadcast %cst_110 : f32 to vector<8x32xf32>
    %373 = arith.addf %372, %371 : vector<8x32xf32>
    %374 = arith.divf %372, %373 : vector<8x32xf32>
    %375 = arith.mulf %366, %347 : vector<8x32xf32>
    %376 = arith.mulf %360, %368 : vector<8x32xf32>
    %377 = arith.addf %375, %376 : vector<8x32xf32>
    %378 = math.tanh %377 : vector<8x32xf32>
    %379 = arith.mulf %374, %378 : vector<8x32xf32>
    %c24_111 = arith.constant 24 : index
    %c0_112 = arith.constant 0 : index
    %380 = vector.load %arg11[%c24_111, %c0_112] : memref<64x32xf32, #tpu.memory_space<vmem>>, vector<8x32xf32>
    tpu.vector_store %arg11[%c24_111, %c0_112], %379 {strides = array<i32>} : memref<64x32xf32, #tpu.memory_space<vmem>>, vector<8x32xf32>,
    %c32_113 = arith.constant 32 : index
    %c0_114 = arith.constant 0 : index
    %381 = vector.load %arg12[%c32_113, %c0_114] : memref<64x128xf32, #tpu.memory_space<vmem>>, vector<8x128xf32>
    %382 = arith.truncf %379 : vector<8x32xf32> to vector<8x32xbf16>
    %cst_115 = arith.constant dense<0.000000e+00> : vector<8x128xf32>
    %383 = tpu.matmul %382, %258, %cst_115 {dimension_numbers = #tpu.dot_dimension_numbers<[1], [0], [0], [1], [0, 0, 1, 1], [], []>} : vector<8x32xbf16>, vector<32x128xbf16>, vector<8x128xf32> -> vector<8x128xf32>
    %384 = arith.addf %381, %383 : vector<8x128xf32>
    %385 = vector.extract_strided_slice %384 {offsets = [0, 0], sizes = [8, 32], strides = [1, 1]} : vector<8x128xf32> to vector<8x32xf32>
    %386 = arith.negf %385 : vector<8x32xf32>
    %387 = math.exp %386 : vector<8x32xf32>
    %cst_116 = arith.constant 1.000000e+00 : f32
    %388 = vector.broadcast %cst_116 : f32 to vector<8x32xf32>
    %389 = arith.addf %388, %387 : vector<8x32xf32>
    %390 = arith.divf %388, %389 : vector<8x32xf32>
    %391 = vector.extract_strided_slice %384 {offsets = [0, 32], sizes = [8, 32], strides = [1, 1]} : vector<8x128xf32> to vector<8x32xf32>
    %392 = arith.negf %391 : vector<8x32xf32>
    %393 = math.exp %392 : vector<8x32xf32>
    %cst_117 = arith.constant 1.000000e+00 : f32
    %394 = vector.broadcast %cst_117 : f32 to vector<8x32xf32>
    %395 = arith.addf %394, %393 : vector<8x32xf32>
    %396 = arith.divf %394, %395 : vector<8x32xf32>
    %397 = vector.extract_strided_slice %384 {offsets = [0, 64], sizes = [8, 32], strides = [1, 1]} : vector<8x128xf32> to vector<8x32xf32>
    %398 = math.tanh %397 : vector<8x32xf32>
    %399 = vector.extract_strided_slice %384 {offsets = [0, 96], sizes = [8, 32], strides = [1, 1]} : vector<8x128xf32> to vector<8x32xf32>
    %400 = arith.negf %399 : vector<8x32xf32>
    %401 = math.exp %400 : vector<8x32xf32>
    %cst_118 = arith.constant 1.000000e+00 : f32
    %402 = vector.broadcast %cst_118 : f32 to vector<8x32xf32>
    %403 = arith.addf %402, %401 : vector<8x32xf32>
    %404 = arith.divf %402, %403 : vector<8x32xf32>
    %405 = arith.mulf %396, %377 : vector<8x32xf32>
    %406 = arith.mulf %390, %398 : vector<8x32xf32>
    %407 = arith.addf %405, %406 : vector<8x32xf32>
    %408 = math.tanh %407 : vector<8x32xf32>
    %409 = arith.mulf %404, %408 : vector<8x32xf32>
    %c32_119 = arith.constant 32 : index
    %c0_120 = arith.constant 0 : index
    %410 = vector.load %arg11[%c32_119, %c0_120] : memref<64x32xf32, #tpu.memory_space<vmem>>, vector<8x32xf32>
    tpu.vector_store %arg11[%c32_119, %c0_120], %409 {strides = array<i32>} : memref<64x32xf32, #tpu.memory_space<vmem>>, vector<8x32xf32>,
    %c40_121 = arith.constant 40 : index
    %c0_122 = arith.constant 0 : index
    %411 = vector.load %arg12[%c40_121, %c0_122] : memref<64x128xf32, #tpu.memory_space<vmem>>, vector<8x128xf32>
    %412 = arith.truncf %409 : vector<8x32xf32> to vector<8x32xbf16>
    %cst_123 = arith.constant dense<0.000000e+00> : vector<8x128xf32>
    %413 = tpu.matmul %412, %258, %cst_123 {dimension_numbers = #tpu.dot_dimension_numbers<[1], [0], [0], [1], [0, 0, 1, 1], [], []>} : vector<8x32xbf16>, vector<32x128xbf16>, vector<8x128xf32> -> vector<8x128xf32>
    %414 = arith.addf %411, %413 : vector<8x128xf32>
    %415 = vector.extract_strided_slice %414 {offsets = [0, 0], sizes = [8, 32], strides = [1, 1]} : vector<8x128xf32> to vector<8x32xf32>
    %416 = arith.negf %415 : vector<8x32xf32>
    %417 = math.exp %416 : vector<8x32xf32>
    %cst_124 = arith.constant 1.000000e+00 : f32
    %418 = vector.broadcast %cst_124 : f32 to vector<8x32xf32>
    %419 = arith.addf %418, %417 : vector<8x32xf32>
    %420 = arith.divf %418, %419 : vector<8x32xf32>
    %421 = vector.extract_strided_slice %414 {offsets = [0, 32], sizes = [8, 32], strides = [1, 1]} : vector<8x128xf32> to vector<8x32xf32>
    %422 = arith.negf %421 : vector<8x32xf32>
    %423 = math.exp %422 : vector<8x32xf32>
    %cst_125 = arith.constant 1.000000e+00 : f32
    %424 = vector.broadcast %cst_125 : f32 to vector<8x32xf32>
    %425 = arith.addf %424, %423 : vector<8x32xf32>
    %426 = arith.divf %424, %425 : vector<8x32xf32>
    %427 = vector.extract_strided_slice %414 {offsets = [0, 64], sizes = [8, 32], strides = [1, 1]} : vector<8x128xf32> to vector<8x32xf32>
    %428 = math.tanh %427 : vector<8x32xf32>
    %429 = vector.extract_strided_slice %414 {offsets = [0, 96], sizes = [8, 32], strides = [1, 1]} : vector<8x128xf32> to vector<8x32xf32>
    %430 = arith.negf %429 : vector<8x32xf32>
    %431 = math.exp %430 : vector<8x32xf32>
    %cst_126 = arith.constant 1.000000e+00 : f32
    %432 = vector.broadcast %cst_126 : f32 to vector<8x32xf32>
    %433 = arith.addf %432, %431 : vector<8x32xf32>
    %434 = arith.divf %432, %433 : vector<8x32xf32>
    %435 = arith.mulf %426, %407 : vector<8x32xf32>
    %436 = arith.mulf %420, %428 : vector<8x32xf32>
    %437 = arith.addf %435, %436 : vector<8x32xf32>
    %438 = math.tanh %437 : vector<8x32xf32>
    %439 = arith.mulf %434, %438 : vector<8x32xf32>
    %c40_127 = arith.constant 40 : index
    %c0_128 = arith.constant 0 : index
    %440 = vector.load %arg11[%c40_127, %c0_128] : memref<64x32xf32, #tpu.memory_space<vmem>>, vector<8x32xf32>
    tpu.vector_store %arg11[%c40_127, %c0_128], %439 {strides = array<i32>} : memref<64x32xf32, #tpu.memory_space<vmem>>, vector<8x32xf32>,
    %c48_129 = arith.constant 48 : index
    %c0_130 = arith.constant 0 : index
    %441 = vector.load %arg12[%c48_129, %c0_130] : memref<64x128xf32, #tpu.memory_space<vmem>>, vector<8x128xf32>
    %442 = arith.truncf %439 : vector<8x32xf32> to vector<8x32xbf16>
    %cst_131 = arith.constant dense<0.000000e+00> : vector<8x128xf32>
    %443 = tpu.matmul %442, %258, %cst_131 {dimension_numbers = #tpu.dot_dimension_numbers<[1], [0], [0], [1], [0, 0, 1, 1], [], []>} : vector<8x32xbf16>, vector<32x128xbf16>, vector<8x128xf32> -> vector<8x128xf32>
    %444 = arith.addf %441, %443 : vector<8x128xf32>
    %445 = vector.extract_strided_slice %444 {offsets = [0, 0], sizes = [8, 32], strides = [1, 1]} : vector<8x128xf32> to vector<8x32xf32>
    %446 = arith.negf %445 : vector<8x32xf32>
    %447 = math.exp %446 : vector<8x32xf32>
    %cst_132 = arith.constant 1.000000e+00 : f32
    %448 = vector.broadcast %cst_132 : f32 to vector<8x32xf32>
    %449 = arith.addf %448, %447 : vector<8x32xf32>
    %450 = arith.divf %448, %449 : vector<8x32xf32>
    %451 = vector.extract_strided_slice %444 {offsets = [0, 32], sizes = [8, 32], strides = [1, 1]} : vector<8x128xf32> to vector<8x32xf32>
    %452 = arith.negf %451 : vector<8x32xf32>
    %453 = math.exp %452 : vector<8x32xf32>
    %cst_133 = arith.constant 1.000000e+00 : f32
    %454 = vector.broadcast %cst_133 : f32 to vector<8x32xf32>
    %455 = arith.addf %454, %453 : vector<8x32xf32>
    %456 = arith.divf %454, %455 : vector<8x32xf32>
    %457 = vector.extract_strided_slice %444 {offsets = [0, 64], sizes = [8, 32], strides = [1, 1]} : vector<8x128xf32> to vector<8x32xf32>
    %458 = math.tanh %457 : vector<8x32xf32>
    %459 = vector.extract_strided_slice %444 {offsets = [0, 96], sizes = [8, 32], strides = [1, 1]} : vector<8x128xf32> to vector<8x32xf32>
    %460 = arith.negf %459 : vector<8x32xf32>
    %461 = math.exp %460 : vector<8x32xf32>
    %cst_134 = arith.constant 1.000000e+00 : f32
    %462 = vector.broadcast %cst_134 : f32 to vector<8x32xf32>
    %463 = arith.addf %462, %461 : vector<8x32xf32>
    %464 = arith.divf %462, %463 : vector<8x32xf32>
    %465 = arith.mulf %456, %437 : vector<8x32xf32>
    %466 = arith.mulf %450, %458 : vector<8x32xf32>
    %467 = arith.addf %465, %466 : vector<8x32xf32>
    %468 = math.tanh %467 : vector<8x32xf32>
    %469 = arith.mulf %464, %468 : vector<8x32xf32>
    %c48_135 = arith.constant 48 : index
    %c0_136 = arith.constant 0 : index
    %470 = vector.load %arg11[%c48_135, %c0_136] : memref<64x32xf32, #tpu.memory_space<vmem>>, vector<8x32xf32>
    tpu.vector_store %arg11[%c48_135, %c0_136], %469 {strides = array<i32>} : memref<64x32xf32, #tpu.memory_space<vmem>>, vector<8x32xf32>,
    %c56_137 = arith.constant 56 : index
    %c0_138 = arith.constant 0 : index
    %471 = vector.load %arg12[%c56_137, %c0_138] : memref<64x128xf32, #tpu.memory_space<vmem>>, vector<8x128xf32>
    %472 = arith.truncf %469 : vector<8x32xf32> to vector<8x32xbf16>
    %cst_139 = arith.constant dense<0.000000e+00> : vector<8x128xf32>
    %473 = tpu.matmul %472, %258, %cst_139 {dimension_numbers = #tpu.dot_dimension_numbers<[1], [0], [0], [1], [0, 0, 1, 1], [], []>} : vector<8x32xbf16>, vector<32x128xbf16>, vector<8x128xf32> -> vector<8x128xf32>
    %474 = arith.addf %471, %473 : vector<8x128xf32>
    %475 = vector.extract_strided_slice %474 {offsets = [0, 0], sizes = [8, 32], strides = [1, 1]} : vector<8x128xf32> to vector<8x32xf32>
    %476 = arith.negf %475 : vector<8x32xf32>
    %477 = math.exp %476 : vector<8x32xf32>
    %cst_140 = arith.constant 1.000000e+00 : f32
    %478 = vector.broadcast %cst_140 : f32 to vector<8x32xf32>
    %479 = arith.addf %478, %477 : vector<8x32xf32>
    %480 = arith.divf %478, %479 : vector<8x32xf32>
    %481 = vector.extract_strided_slice %474 {offsets = [0, 32], sizes = [8, 32], strides = [1, 1]} : vector<8x128xf32> to vector<8x32xf32>
    %482 = arith.negf %481 : vector<8x32xf32>
    %483 = math.exp %482 : vector<8x32xf32>
    %cst_141 = arith.constant 1.000000e+00 : f32
    %484 = vector.broadcast %cst_141 : f32 to vector<8x32xf32>
    %485 = arith.addf %484, %483 : vector<8x32xf32>
    %486 = arith.divf %484, %485 : vector<8x32xf32>
    %487 = vector.extract_strided_slice %474 {offsets = [0, 64], sizes = [8, 32], strides = [1, 1]} : vector<8x128xf32> to vector<8x32xf32>
    %488 = math.tanh %487 : vector<8x32xf32>
    %489 = vector.extract_strided_slice %474 {offsets = [0, 96], sizes = [8, 32], strides = [1, 1]} : vector<8x128xf32> to vector<8x32xf32>
    %490 = arith.negf %489 : vector<8x32xf32>
    %491 = math.exp %490 : vector<8x32xf32>
    %cst_142 = arith.constant 1.000000e+00 : f32
    %492 = vector.broadcast %cst_142 : f32 to vector<8x32xf32>
    %493 = arith.addf %492, %491 : vector<8x32xf32>
    %494 = arith.divf %492, %493 : vector<8x32xf32>
    %495 = arith.mulf %486, %467 : vector<8x32xf32>
    %496 = arith.mulf %480, %488 : vector<8x32xf32>
    %497 = arith.addf %495, %496 : vector<8x32xf32>
    %498 = math.tanh %497 : vector<8x32xf32>
    %499 = arith.mulf %494, %498 : vector<8x32xf32>
    %c56_143 = arith.constant 56 : index
    %c0_144 = arith.constant 0 : index
    %500 = vector.load %arg11[%c56_143, %c0_144] : memref<64x32xf32, #tpu.memory_space<vmem>>, vector<8x32xf32>
    tpu.vector_store %arg11[%c56_143, %c0_144], %499 {strides = array<i32>} : memref<64x32xf32, #tpu.memory_space<vmem>>, vector<8x32xf32>,
    %c0_145 = arith.constant 0 : index
    %c0_146 = arith.constant 0 : index
    %501 = vector.load %arg11[%c0_145, %c0_146] : memref<64x32xf32, #tpu.memory_space<vmem>>, vector<64x32xf32>
    %502 = arith.truncf %501 : vector<64x32xf32> to vector<64x32xbf16>
    %c0_147 = arith.constant 0 : index
    %c0_148 = arith.constant 0 : index
    %503 = vector.load %arg8[%c0_147, %c0_148] : memref<32x128xbf16, #tpu.memory_space<vmem>>, vector<32x128xbf16>
    %cst_149 = arith.constant dense<0.000000e+00> : vector<64x128xf32>
    %504 = tpu.matmul %502, %503, %cst_149 {dimension_numbers = #tpu.dot_dimension_numbers<[1], [0], [0], [1], [0, 0, 1, 1], [], []>} : vector<64x32xbf16>, vector<32x128xbf16>, vector<64x128xf32> -> vector<64x128xf32>
    %c0_150 = arith.constant 0 : index
    %c0_151 = arith.constant 0 : index
    %505 = vector.load %arg9[%c0_150, %c0_151] : memref<1x128xf32, #tpu.memory_space<vmem>>, vector<1x128xf32>
    %506 = vector.broadcast %505 : vector<1x128xf32> to vector<64x128xf32>
    %507 = arith.addf %504, %506 : vector<64x128xf32>
    %c0_152 = arith.constant 0 : index
    %c0_153 = arith.constant 0 : index
    %508 = vector.load %arg10[%c0_152, %c0_153] : memref<64x128xf32, #tpu.memory_space<vmem>>, vector<64x128xf32>
    tpu.vector_store %arg10[%c0_152, %c0_153], %507 {strides = array<i32>} : memref<64x128xf32, #tpu.memory_space<vmem>>, vector<64x128xf32>,
    return
  }
  func.func @transform_0(%arg0: i32) -> (i32, i32) {
    %c0_i32 = arith.constant 0 : i32
    %c0_i32_0 = arith.constant 0 : i32
    %c0_i32_1 = arith.constant 0 : i32
    return %c0_i32, %c0_i32_0 : i32, i32
  }
  func.func @transform_1(%arg0: i32) -> (i32, i32) {
    %c0_i32 = arith.constant 0 : i32
    %c0_i32_0 = arith.constant 0 : i32
    %c0_i32_1 = arith.constant 0 : i32
    return %c0_i32, %c0_i32_0 : i32, i32
  }
  func.func @transform_2(%arg0: i32) -> (i32, i32) {
    %c0_i32 = arith.constant 0 : i32
    %c0_i32_0 = arith.constant 0 : i32
    %c0_i32_1 = arith.constant 0 : i32
    return %c0_i32, %c0_i32_0 : i32, i32
  }
  func.func @transform_3(%arg0: i32) -> (i32, i32) {
    %c0_i32 = arith.constant 0 : i32
    %c0_i32_0 = arith.constant 0 : i32
    %c0_i32_1 = arith.constant 0 : i32
    return %c0_i32, %c0_i32_0 : i32, i32
  }
  func.func @transform_4(%arg0: i32) -> (i32, i32) {
    %c0_i32 = arith.constant 0 : i32
    %c0_i32_0 = arith.constant 0 : i32
    %c0_i32_1 = arith.constant 0 : i32
    return %c0_i32, %c0_i32_0 : i32, i32
  }
  func.func @transform_5(%arg0: i32) -> (i32, i32) {
    %c0_i32 = arith.constant 0 : i32
    %c0_i32_0 = arith.constant 0 : i32
    %c0_i32_1 = arith.constant 0 : i32
    return %c0_i32, %c0_i32_0 : i32, i32
  }
  func.func @transform_6(%arg0: i32) -> (i32, i32) {
    %c0_i32 = arith.constant 0 : i32
    %c0_i32_0 = arith.constant 0 : i32
    %c0_i32_1 = arith.constant 0 : i32
    return %c0_i32, %c0_i32_0 : i32, i32
  }
  func.func @transform_7(%arg0: i32) -> (i32, i32) {
    %c0_i32 = arith.constant 0 : i32
    %c0_i32_0 = arith.constant 0 : i32
    %c0_i32_1 = arith.constant 0 : i32
    return %c0_i32, %c0_i32_0 : i32, i32
  }
  func.func @transform_8(%arg0: i32) -> (i32, i32) {
    %c0_i32 = arith.constant 0 : i32
    %c0_i32_0 = arith.constant 0 : i32
    %c0_i32_1 = arith.constant 0 : i32
    return %c0_i32, %c0_i32_0 : i32, i32
  }
  func.func @transform_9(%arg0: i32) -> (i32, i32) {
    %c0_i32 = arith.constant 0 : i32
    %c0_i32_0 = arith.constant 0 : i32
    %c0_i32_1 = arith.constant 0 : i32
    return %c0_i32, %c0_i32_0 : i32, i32
  }
}

</mosaic_0001>

<bundles_post_ra>
// kernel: ner_forward.1
= control target key start
LH: loop header
LB: loop body
LE: loop exit
PB: predicated region body
PF: predicated region fallthrough
CT: control target
= control target key end

     0   :  { %vm84_vm0 = vcmask 261120   ;;  %v2123_v7 = vmov 0.0   ;;  %vm2124_vm1 = vmmov 0   ;;  %v2125_v9 = vmov 0   ;;  %s2127_s24 = smov 32   ;;  %s2597_s1 = inlined_call_operand.vmem [shape: bf16[32,128], index: 1, kind: input, shape index: {}]   ;;  %s2598_s0 = inlined_call_operand.vmem [shape: bf16[64,32], index: 0, kind: input, shape index: {}]   ;;  %s2599_s2 = inlined_call_operand.vmem [shape: bf16[32,128], index: 2, kind: input, shape index: {}]   ;;  %s2600_s3 = inlined_call_operand.vmem [shape: f32[1,128], index: 3, kind: input, shape index: {}]   ;;  %s2601_s4 = inlined_call_operand.vmem [shape: bf16[32,128], index: 4, kind: input, shape index: {}]   ;;  %s2602_s5 = inlined_call_operand.vmem [shape: bf16[32,128], index: 5, kind: input, shape index: {}]   ;;  %s2603_s6 = inlined_call_operand.vmem [shape: f32[1,128], index: 6, kind: input, shape index: {}]   ;;  %s2604_s7 = inlined_call_operand.vmem [shape: bf16[32,128], index: 7, kind: input, shape index: {}]   ;;  %s2605_s8 = inlined_call_operand.vmem [shape: f32[1,128], index: 8, kind: input, shape index: {}]   ;;  %s2606_s9 = inlined_call_operand.vmem [shape: f32[64,128], index: 9, kind: output, shape index: {}]  }
   0x1   :  { %v1981_v0 = vld [vmem:[%s2597_s1] sm:$0xff]   ;;  %v1982_v1 = vld [vmem:[%s2597_s1 + $0x8] sm:$0xff]   ;;  %v1983_v2 = vld [vmem:[%s2598_s0 + $0x10] sm:$0xff]  }
   0x2   :  { %1972 = vmatprep.subr.bf16.mxu1 %v1981_v0  ;;  %1808 = vmatprep.subr.bf16.mxu0 %v1981_v0  ;;  %v1984_v3 = vld [vmem:[%s2598_s0 + $0x18] sm:$0xff]   ;;  %v1986_v4 = vld [vmem:[%s2598_s0] sm:$0xff]   ;;  %v1987_v5 = vld [vmem:[%s2598_s0 + $0x8] sm:$0xff]  }
   0x3   :  { %1974 = vmatpush3.bf16.msra.mxu1 %v1981_v0  ;;  %1809 = vmatpush3.bf16.msra.mxu0 %v1981_v0  ;;  %v2200_v6 = vld [vmem:[%s2599_s2] sm:$0xff]   ;;  %v2211_v8 = vld [vmem:[%s2599_s2 + $0x8] sm:$0xff]  }
   0x4   :  { %1973 = vmatprep.subr.bf16.mxu1 %v1982_v1  ;;  %1810 = vmatprep.subr.bf16.mxu0 %v1982_v1  ;;  %v1683_v10 = vld [vmem:[%s2600_s3] ss:$0 sm:$0xff]  ;;  %s2126_s3 = smov 64  }
   0x5   :  { %1816 = vmatprep.mubr.msk.bf16.mxu1 %vm84_vm0, %v1983_v2  ;;  %1812 = vmatprep.mubr.msk.bf16.mxu0 %vm84_vm0, %v1986_v4 }
   0x7   :  { %1975 = vmatpush3.bf16.msra.mxu1 %v1982_v1  ;;  %1811 = vmatpush3.bf16.msra.mxu0 %v1982_v1 }
   0x8   :  { %1820 = vmatprep.subr.bf16.mxu1 %v2123_v7  ;;  %1836 = vmatprep.subr.bf16.mxu0 %v2123_v7 }
   0xa   :  { %1817 = vmatmul.mubr.msk.bf16.vlgmr.msra.gmra.mrb[0].mxu1 %vm84_vm0, %v1984_v3  ;;  %1813 = vmatmul.mubr.msk.bf16.vlgmr.msra.gmra.mrb[0].mxu0 %vm84_vm0, %v1987_v5 }
   0xb   :  { %1821 = vmatpush3.bf16.msra.mxu1 %v2200_v6  ;;  %1824 = vmatprep.mubr.msk.bf16.mxu1 %vm2124_vm1, %v2123_v7 }
   0xc   :  { %1822 = vmatprep.subr.bf16.mxu1 %v2123_v7  ;;  %1837 = vmatpush3.bf16.msra.mxu0 %v2200_v6 }
   0xd   :  { %1838 = vmatprep.subr.bf16.mxu0 %v2123_v7  ;;  %1840 = vmatprep.mubr.msk.bf16.mxu0 %vm2124_vm1, %v2123_v7 }
   0xf   :  { %1823 = vmatpush3.bf16.msra.mxu1 %v2211_v8 }
  0x10   :  { %1828 = vmatprep.subr.bf16.mxu1 %v2123_v7  ;;  %1839 = vmatpush3.bf16.msra.mxu0 %v2211_v8 }
  0x11   :  { %1852 = vmatprep.subr.bf16.mxu0 %v2123_v7 }
  0x12   :  { %1825 = vmatmul.mubr.bf16.vlgmr.msra.gmra.mrb[4].mxu1 %v2125_v9 }
  0x13   :  { %1829 = vmatpush3.bf16.msra.mxu1 %v2200_v6  ;;  %1832 = vmatprep.mubr.msk.bf16.mxu1 %vm2124_vm1, %v2123_v7 }
  0x14   :  { %1830 = vmatprep.subr.bf16.mxu1 %v2123_v7 }
  0x17   :  { %1831 = vmatpush3.bf16.msra.mxu1 %v2211_v8 }
  0x18   :  { %1844 = vmatprep.subr.bf16.mxu1 %v2123_v7 }
  0xdd   :  { %v1818_v11 = vpop.f32.mrb[0].mxu1  ;;  %v1814_v12 = vpop.f32.mrb[0].mxu0 }
  0xde   :  { %v2234_v13 = vadd.f32 %v1818_v11, %v1683_v10  ;;  %v147_v14 = vpop.f32.mrb[1].mxu1  ;;  %v2236_v15 = vadd.f32 %v1814_v12, %v1683_v10  ;;  %v131_v16 = vpop.f32.mrb[1].mxu0 }
  0xdf   :  { %v2238_v17 = vadd.f32 %v1683_v10, %v147_v14  ;;  %v1819_v18 = vpop.f32.mrb[2].mxu1  ;;  %v1815_v19 = vpop.f32.mrb[2].mxu0  ;;  %v132_v26 = vadd.f32 %v1683_v10, %v131_v16 }
  0xe0   :  { %v2240_v20 = vadd.f32 %v1819_v18, %v1683_v10  ;;  %v150_v21 = vpop.f32.mrb[3].mxu1  ;;  %v2242_v22 = vadd.f32 %v1815_v19, %v1683_v10  ;;  %v134_v23 = vpop.f32.mrb[3].mxu0 }
  0xe1   :  { %v2244_v24 = vadd.f32 %v1683_v10, %v150_v21  ;;  %v135_v25 = vadd.f32 %v1683_v10, %v134_v23 }
  0xe5   :  { %v224_v27 = vpop.f32.mrb[4].mxu1 }
  0xe6   :  { %v230_v28 = vadd.f32 %v224_v27, %v132_v26  ;;  %v1826_v29 = vpop.f32.mrb[5].mxu1 }
  0xe7   :  { %v227_v30 = vpop.f32.mrb[6].mxu1 }
  0xe8   :  { %1995 = vtanh.f32 %v230_v28  ;;  %v1827_v31 = vpop.f32.mrb[7].mxu1  ;;  %v1696_v33 = vmul.f32 -1.442695, %v230_v28 }
  0xea   :  { %1997 = vpow2.f32 %v1696_v33 }
  0xf2   :  { %v1996_v32 = vpop.eup %1995 }
  0xf3   :  { %240 = vrot.lane.b32.xlu0 %v1996_v32, %s2126_s3 }
  0xf4   :  { %v1998_v34 = vpop.eup %1997 }
  0xf5   :  { %v234_v35 = vadd.f32 1.0, %v1998_v34 }
  0xf7   :  { %1999 = vrcp.f32 %v234_v35 }
 0x101   :  { %v2000_v36 = vpop.eup %1999 }
 0x102   :  { %v238_v39 = vmul.f32 0.0, %v2000_v36 }
 0x165   :  { %v241_v37 = vpop.permute.xlu0 %240 }
 0x166   :  { %v243_v38 = vmul.f32 %v2000_v36, %v241_v37 }
 0x168   :  { %245 = vrot.lane.b32.xlu0 %v243_v38, %s2127_s24 }
 0x1da   :  { %v246_v40 = vpop.permute.xlu0 %245 }
 0x1db   :  { %v248_v41 = vadd.f32 %v246_v40, %v238_v39 }
 0x1dd   :  { %2001 = vtanh.f32 %v248_v41 }
 0x1e7   :  { %v2002_v42 = vpop.eup %2001 }
 0x1e8   :  { %251 = vrot.lane.b32.xlu1 %v2002_v42, %s2126_s3 }
 0x25a   :  { %v252_v43 = vpop.permute.xlu1 %251 }
 0x25b   :  { %v2249_v44 = vmul.f32 %v2000_v36, %v252_v43 }
 0x25d   :  { %v261_v45 = vpack.c.bf16 %v2249_v44, %v2249_v44 }
 0x25f   :  { %263 = vrot.lane.b32.xlu1 %v261_v45, %s2127_s24 }
 0x2d1   :  { %v264_v46 = vpop.permute.xlu1 %263 }
 0x2d2   :  { %1833 = vmatmul.mubr.msk.bf16.vlgmr.msra.gmra.mrb[8].mxu1 %vm84_vm0, %v264_v46 }
 0x2d3   :  { %1845 = vmatpush3.bf16.msra.mxu1 %v2200_v6  ;;  %1848 = vmatprep.mubr.msk.bf16.mxu1 %vm2124_vm1, %v2123_v7 }
 0x2d4   :  { %1846 = vmatprep.subr.bf16.mxu1 %v2123_v7 }
 0x2d7   :  { %1847 = vmatpush3.bf16.msra.mxu1 %v2211_v8 }
 0x2d8   :  { %1860 = vmatprep.subr.bf16.mxu1 %v2123_v7 }
 0x3a5   :  { %v302_v47 = vpop.f32.mrb[8].mxu1 }
 0x3a6   :  { %v308_v48 = vadd.f32 %v302_v47, %v135_v25  ;;  %v1834_v49 = vpop.f32.mrb[9].mxu1 }
 0x3a7   :  { %v305_v50 = vpop.f32.mrb[10].mxu1 }
 0x3a8   :  { %2003 = vtanh.f32 %v308_v48  ;;  %v1835_v51 = vpop.f32.mrb[11].mxu1  ;;  %v1698_v53 = vmul.f32 -1.442695, %v308_v48 }
 0x3aa   :  { %2005 = vpow2.f32 %v1698_v53 }
 0x3b2   :  { %v2004_v52 = vpop.eup %2003 }
 0x3b3   :  { %318 = vrot.lane.b32.xlu0 %v2004_v52, %s2126_s3 }
 0x3b4   :  { %v2006_v54 = vpop.eup %2005 }
 0x3b5   :  { %v312_v55 = vadd.f32 1.0, %v2006_v54 }
 0x3b7   :  { %2007 = vrcp.f32 %v312_v55 }
 0x3c1   :  { %v2008_v56 = vpop.eup %2007 }
 0x3c2   :  { %v316_v59 = vmul.f32 %v2008_v56, %v248_v41 }
 0x425   :  { %v319_v57 = vpop.permute.xlu0 %318 }
 0x426   :  { %v321_v58 = vmul.f32 %v2008_v56, %v319_v57 }
 0x428   :  { %323 = vrot.lane.b32.xlu1 %v321_v58, %s2127_s24 }
 0x49a   :  { %v324_v60 = vpop.permute.xlu1 %323 }
 0x49b   :  { %v326_v61 = vadd.f32 %v324_v60, %v316_v59 }
 0x49d   :  { %2009 = vtanh.f32 %v326_v61 }
 0x4a7   :  { %v2010_v62 = vpop.eup %2009 }
 0x4a8   :  { %329 = vrot.lane.b32.xlu0 %v2010_v62, %s2126_s3 }
 0x51a   :  { %v330_v63 = vpop.permute.xlu0 %329 }
 0x51b   :  { %v2264_v0 = vmul.f32 %v2008_v56, %v330_v63 }
 0x51d   :  { %v339_v1 = vpack.c.bf16 %v2264_v0, %v2264_v0 }
 0x51f   :  { %341 = vrot.lane.b32.xlu1 %v339_v1, %s2127_s24 }
 0x591   :  { %v342_v2 = vpop.permute.xlu1 %341 }
 0x592   :  { %1841 = vmatmul.mubr.msk.bf16.vlgmr.msra.gmra.mrb[4].mxu0 %vm84_vm0, %v342_v2 }
 0x593   :  { %1853 = vmatpush3.bf16.msra.mxu0 %v2200_v6  ;;  %1856 = vmatprep.mubr.msk.bf16.mxu0 %vm2124_vm1, %v2123_v7 }
 0x594   :  { %1854 = vmatprep.subr.bf16.mxu0 %v2123_v7 }
 0x597   :  { %1855 = vmatpush3.bf16.msra.mxu0 %v2211_v8 }
 0x598   :  { %1868 = vmatprep.subr.bf16.mxu0 %v2123_v7 }
 0x665   :  { %v380_v3 = vpop.f32.mrb[4].mxu0 }
 0x666   :  { %v386_v4 = vadd.f32 %v380_v3, %v2236_v15  ;;  %v1842_v5 = vpop.f32.mrb[5].mxu0 }
 0x667   :  { %v383_v10 = vpop.f32.mrb[6].mxu0 }
 0x668   :  { %2011 = vtanh.f32 %v386_v4  ;;  %v1843_v11 = vpop.f32.mrb[7].mxu0  ;;  %v1700_v14 = vmul.f32 -1.442695, %v386_v4 }
 0x66a   :  { %2013 = vpow2.f32 %v1700_v14 }
 0x672   :  { %v2012_v12 = vpop.eup %2011 }
 0x673   :  { %396 = vrot.lane.b32.xlu0 %v2012_v12, %s2126_s3 }
 0x674   :  { %v2014_v16 = vpop.eup %2013 }
 0x675   :  { %v390_v18 = vadd.f32 1.0, %v2014_v16 }
 0x677   :  { %2015 = vrcp.f32 %v390_v18 }
 0x681   :  { %v2016_v19 = vpop.eup %2015 }
 0x682   :  { %v394_v25 = vmul.f32 %v2016_v19, %v326_v61 }
 0x6e5   :  { %v397_v21 = vpop.permute.xlu0 %396 }
 0x6e6   :  { %v399_v23 = vmul.f32 %v2016_v19, %v397_v21 }
 0x6e8   :  { %401 = vrot.lane.b32.xlu1 %v399_v23, %s2127_s24 }
 0x75a   :  { %v402_v26 = vpop.permute.xlu1 %401 }
 0x75b   :  { %v404_v15 = vadd.f32 %v402_v26, %v394_v25 }
 0x75d   :  { %2017 = vtanh.f32 %v404_v15 }
 0x767   :  { %v2018_v27 = vpop.eup %2017 }
 0x768   :  { %407 = vrot.lane.b32.xlu0 %v2018_v27, %s2126_s3 }
 0x7da   :  { %v408_v28 = vpop.permute.xlu0 %407 }
 0x7db   :  { %v2280_v29 = vmul.f32 %v2016_v19, %v408_v28 }
 0x7dd   :  { %v417_v30 = vpack.c.bf16 %v2280_v29, %v2280_v29 }
 0x7df   :  { %419 = vrot.lane.b32.xlu1 %v417_v30, %s2127_s24 }
 0x851   :  { %v420_v31 = vpop.permute.xlu1 %419 }
 0x852   :  { %1849 = vmatmul.mubr.msk.bf16.vlgmr.msra.gmra.mrb[12].mxu1 %vm84_vm0, %v420_v31 }
 0x853   :  { %1861 = vmatpush3.bf16.msra.mxu1 %v2200_v6  ;;  %1864 = vmatprep.mubr.msk.bf16.mxu1 %vm2124_vm1, %v2123_v7 }
 0x854   :  { %1862 = vmatprep.subr.bf16.mxu1 %v2123_v7 }
 0x857   :  { %1863 = vmatpush3.bf16.msra.mxu1 %v2211_v8 }
 0x858   :  { %1876 = vmatprep.subr.bf16.mxu1 %v2123_v7 }
 0x925   :  { %v458_v32 = vpop.f32.mrb[12].mxu1 }
 0x926   :  { %v464_v33 = vadd.f32 %v458_v32, %v2242_v22  ;;  %v1850_v34 = vpop.f32.mrb[13].mxu1 }
 0x927   :  { %v461_v35 = vpop.f32.mrb[14].mxu1 }
 0x928   :  { %2019 = vtanh.f32 %v464_v33  ;;  %v1851_v36 = vpop.f32.mrb[15].mxu1  ;;  %v1702_v38 = vmul.f32 -1.442695, %v464_v33 }
 0x92a   :  { %2021 = vpow2.f32 %v1702_v38 }
 0x932   :  { %v2020_v37 = vpop.eup %2019 }
 0x933   :  { %474 = vrot.lane.b32.xlu0 %v2020_v37, %s2126_s3 }
 0x934   :  { %v2022_v39 = vpop.eup %2021 }
 0x935   :  { %v468_v40 = vadd.f32 1.0, %v2022_v39 }
 0x937   :  { %2023 = vrcp.f32 %v468_v40 }
 0x941   :  { %v2024_v41 = vpop.eup %2023 }
 0x942   :  { %v472_v45 = vmul.f32 %v2024_v41, %v404_v15 }
 0x9a5   :  { %v475_v42 = vpop.permute.xlu0 %474 }
 0x9a6   :  { %v477_v43 = vmul.f32 %v2024_v41, %v475_v42 }
 0x9a8   :  { %479 = vrot.lane.b32.xlu1 %v477_v43, %s2127_s24 }
 0xa1a   :  { %v480_v46 = vpop.permute.xlu1 %479 }
 0xa1b   :  { %v482_v22 = vadd.f32 %v480_v46, %v472_v45 }
 0xa1d   :  { %2025 = vtanh.f32 %v482_v22 }
 0xa27   :  { %v2026_v47 = vpop.eup %2025 }
 0xa28   :  { %485 = vrot.lane.b32.xlu0 %v2026_v47, %s2126_s3 }
 0xa9a   :  { %v486_v48 = vpop.permute.xlu0 %485 }
 0xa9b   :  { %v2296_v49 = vmul.f32 %v2024_v41, %v486_v48 }
 0xa9d   :  { %v495_v50 = vpack.c.bf16 %v2296_v49, %v2296_v49 }
 0xa9f   :  { %497 = vrot.lane.b32.xlu1 %v495_v50, %s2127_s24 }
 0xb11   :  { %v498_v51 = vpop.permute.xlu1 %497 }
 0xb12   :  { %1857 = vmatmul.mubr.msk.bf16.vlgmr.msra.gmra.mrb[8].mxu0 %vm84_vm0, %v498_v51 }
 0xb13   :  { %1869 = vmatpush3.bf16.msra.mxu0 %v2200_v6  ;;  %1872 = vmatprep.mubr.msk.bf16.mxu0 %vm2124_vm1, %v2123_v7 }
 0xb14   :  { %1870 = vmatprep.subr.bf16.mxu0 %v2123_v7 }
 0xb17   :  { %1871 = vmatpush3.bf16.msra.mxu0 %v2211_v8 }
 0xbe5   :  { %v536_v52 = vpop.f32.mrb[8].mxu0 }
 0xbe6   :  { %v542_v53 = vadd.f32 %v536_v52, %v2238_v17  ;;  %v1858_v54 = vpop.f32.mrb[9].mxu0  ;;  %v1989_v52 = vld [vmem:[%s2601_s4] sm:$0xff]  }
 0xbe7   :  { %v539_v55 = vpop.f32.mrb[10].mxu0  ;;  %1884 = vmatprep.subr.bf16.mxu0 %v1989_v52 }
 0xbe8   :  { %2027 = vtanh.f32 %v542_v53  ;;  %v1859_v56 = vpop.f32.mrb[11].mxu0  ;;  %v1704_v58 = vmul.f32 -1.442695, %v542_v53 }
 0xbea   :  { %2029 = vpow2.f32 %v1704_v58 }
 0xbf2   :  { %v2028_v57 = vpop.eup %2027 }
 0xbf3   :  { %552 = vrot.lane.b32.xlu0 %v2028_v57, %s2126_s3 }
 0xbf4   :  { %v2030_v59 = vpop.eup %2029 }
 0xbf5   :  { %v546_v60 = vadd.f32 1.0, %v2030_v59 }
 0xbf7   :  { %2031 = vrcp.f32 %v546_v60 }
 0xc01   :  { %v2032_v61 = vpop.eup %2031 }
 0xc02   :  { %v550_v1 = vmul.f32 %v2032_v61, %v482_v22 }
 0xc65   :  { %v553_v62 = vpop.permute.xlu0 %552 }
 0xc66   :  { %v555_v63 = vmul.f32 %v2032_v61, %v553_v62  ;;  %v2368_v62 = vld [vmem:[%s2602_s5] sm:$0xff]  }
 0xc68   :  { %557 = vrot.lane.b32.xlu1 %v555_v63, %s2127_s24  ;;  %v2376_v63 = vld [vmem:[%s2602_s5 + $0x8] sm:$0xff]  }
 0xcda   :  { %v558_v2 = vpop.permute.xlu1 %557 }
 0xcdb   :  { %v560_v17 = vadd.f32 %v558_v2, %v550_v1 }
 0xcdd   :  { %2033 = vtanh.f32 %v560_v17 }
 0xce7   :  { %v2034_v3 = vpop.eup %2033 }
 0xce8   :  { %563 = vrot.lane.b32.xlu0 %v2034_v3, %s2126_s3 }
 0xd5a   :  { %v564_v4 = vpop.permute.xlu0 %563 }
 0xd5b   :  { %v2311_v5 = vmul.f32 %v2032_v61, %v564_v4 }
 0xd5d   :  { %v573_v10 = vpack.c.bf16 %v2311_v5, %v2311_v5 }
 0xd5f   :  { %575 = vrot.lane.b32.xlu1 %v573_v10, %s2127_s24 }
 0xdd1   :  { %v576_v11 = vpop.permute.xlu1 %575 }
 0xdd2   :  { %1865 = vmatmul.mubr.msk.bf16.vlgmr.msra.gmra.mrb[16].mxu1 %vm84_vm0, %v576_v11 }
 0xdd3   :  { %1877 = vmatpush3.bf16.msra.mxu1 %v2200_v6  ;;  %1880 = vmatprep.mubr.msk.bf16.mxu1 %vm2124_vm1, %v2123_v7 }
 0xdd4   :  { %1878 = vmatprep.subr.bf16.mxu1 %v2123_v7 }
 0xdd7   :  { %1879 = vmatpush3.bf16.msra.mxu1 %v2211_v8 }
 0xdd8   :  { %1896 = vmatprep.subr.bf16.mxu1 %v2123_v7 }
 0xea5   :  { %v614_v12 = vpop.f32.mrb[16].mxu1 }
 0xea6   :  { %v620_v14 = vadd.f32 %v614_v12, %v2244_v24  ;;  %v1866_v16 = vpop.f32.mrb[17].mxu1 }
 0xea7   :  { %v617_v18 = vpop.f32.mrb[18].mxu1  ;;  %v2404_v16 = vld [vmem:[%s2603_s6] ss:$0 sm:$0xff] }
 0xea8   :  { %2035 = vtanh.f32 %v620_v14  ;;  %v1867_v19 = vpop.f32.mrb[19].mxu1  ;;  %v1706_v6 = vmul.f32 -1.442695, %v620_v14 }
 0xeaa   :  { %2037 = vpow2.f32 %v1706_v6 }
 0xeb2   :  { %v2036_v21 = vpop.eup %2035 }
 0xeb3   :  { %630 = vrot.lane.b32.xlu0 %v2036_v21, %s2126_s3 }
 0xeb4   :  { %v2038_v23 = vpop.eup %2037 }
 0xeb5   :  { %v624_v25 = vadd.f32 1.0, %v2038_v23 }
 0xeb7   :  { %2039 = vrcp.f32 %v624_v25 }
 0xec1   :  { %v2040_v26 = vpop.eup %2039 }
 0xec2   :  { %v628_v27 = vmul.f32 %v2040_v26, %v560_v17 }
 0xf25   :  { %v631_v15 = vpop.permute.xlu0 %630 }
 0xf26   :  { %v633_v8 = vmul.f32 %v2040_v26, %v631_v15 }
 0xf28   :  { %635 = vrot.lane.b32.xlu1 %v633_v8, %s2127_s24 }
 0xf9a   :  { %v636_v28 = vpop.permute.xlu1 %635 }
 0xf9b   :  { %v638_v24 = vadd.f32 %v636_v28, %v628_v27 }
 0xf9d   :  { %2041 = vtanh.f32 %v638_v24 }
 0xfa7   :  { %v2042_v30 = vpop.eup %2041 }
 0xfa8   :  { %641 = vrot.lane.b32.xlu0 %v2042_v30, %s2126_s3 }
0x101a   :  { %v642_v31 = vpop.permute.xlu0 %641 }
0x101b   :  { %v2327_v32 = vmul.f32 %v2040_v26, %v642_v31 }
0x101d   :  { %v651_v33 = vpack.c.bf16 %v2327_v32, %v2327_v32 }
0x101f   :  { %653 = vrot.lane.b32.xlu1 %v651_v33, %s2127_s24 }
0x1091   :  { %v654_v34 = vpop.permute.xlu1 %653 }
0x1092   :  { %1873 = vmatmul.mubr.msk.bf16.vlgmr.msra.gmra.mrb[12].mxu0 %vm84_vm0, %v654_v34 }
0x1093   :  { %1885 = vmatpush3.bf16.msra.mxu0 %v1989_v52 }
0x1165   :  { %v692_v35 = vpop.f32.mrb[12].mxu0 }
0x1166   :  { %v698_v36 = vadd.f32 %v692_v35, %v2234_v13  ;;  %v1874_v37 = vpop.f32.mrb[13].mxu0 }
0x1167   :  { %v695_v38 = vpop.f32.mrb[14].mxu0 }
0x1168   :  { %2043 = vtanh.f32 %v698_v36  ;;  %v1875_v39 = vpop.f32.mrb[15].mxu0  ;;  %v1708_v41 = vmul.f32 -1.442695, %v698_v36 }
0x116a   :  { %2045 = vpow2.f32 %v1708_v41 }
0x1172   :  { %v2044_v40 = vpop.eup %2043 }
0x1173   :  { %708 = vrot.lane.b32.xlu0 %v2044_v40, %s2126_s3 }
0x1174   :  { %v2046_v42 = vpop.eup %2045 }
0x1175   :  { %v702_v43 = vadd.f32 1.0, %v2046_v42 }
0x1177   :  { %2047 = vrcp.f32 %v702_v43 }
0x1181   :  { %v2048_v45 = vpop.eup %2047 }
0x1182   :  { %v706_v13 = vmul.f32 %v2048_v45, %v638_v24 }
0x11e5   :  { %v709_v46 = vpop.permute.xlu0 %708 }
0x11e6   :  { %v711_v22 = vmul.f32 %v2048_v45, %v709_v46 }
0x11e8   :  { %713 = vrot.lane.b32.xlu1 %v711_v22, %s2127_s24 }
0x11ec   :  { %256 = vrot.lane.b32.xlu1 %v2249_v44, %s2127_s24  ;;  %v1990_v44 = vld [vmem:[%s2601_s4 + $0x8] sm:$0xff]  }
0x11ed   :  { %1886 = vmatprep.subr.bf16.mxu0 %v1990_v44 }
0x11ee   :  { %1887 = vmatpush3.bf16.msra.mxu0 %v1990_v44 }
0x11ef   :  { %1912 = vmatprep.subr.bf16.mxu0 %v2123_v7 }
0x11f0   :  { %412 = vrot.lane.b32.xlu1 %v2280_v29, %s2127_s24 }
0x125a   :  { %v714_v47 = vpop.permute.xlu1 %713 }
0x125b   :  { %v2340_v48 = vadd.f32 %v714_v47, %v706_v13 }
0x125d   :  { %2049 = vtanh.f32 %v2340_v48 }
0x125e   :  { %v257_v50 = vpop.permute.xlu1 %256 }
0x125f   :  { %259 = vst.msk [vmem:[#allocation2] sm:$0xff] %vm84_vm0, %v257_v50 }
0x1262   :  { %v413_v51 = vpop.permute.xlu1 %412 }
0x1263   :  { %415 = vst.msk [vmem:[#allocation2 + $0x10] sm:$0xff] %vm84_vm0, %v413_v51 }
0x1266   :  { %v806_v58 = vld [vmem:[#allocation2] sm:$0xff] }
0x1267   :  { %v2050_v29 = vpop.eup %2049 }
0x1268   :  { %719 = vrot.lane.b32.xlu0 %v2050_v29, %s2126_s3 }
0x126c   :  { %334 = vrot.lane.b32.xlu0 %v2264_v0, %s2127_s24 }
0x1270   :  { %490 = vrot.lane.b32.xlu0 %v2296_v49, %s2127_s24  ;;  %v808_v49 = vld [vmem:[#allocation2 + $0x10] sm:$0xff] }
0x12da   :  { %v720_v53 = vpop.permute.xlu0 %719 }
0x12db   :  { %v2357_v54 = vmul.f32 %v2048_v45, %v720_v53 }
0x12dd   :  { %v729_v55 = vpack.c.bf16 %v2357_v54, %v2357_v54 }
0x12de   :  { %v335_v56 = vpop.permute.xlu0 %334 }
0x12df   :  { %337 = vst.msk [vmem:[#allocation2 + $0x8] sm:$0xff] %vm84_vm0, %v335_v56  ;;  %731 = vrot.lane.b32.xlu1 %v729_v55, %s2127_s24 }
0x12e2   :  { %v491_v57 = vpop.permute.xlu0 %490 }
0x12e3   :  { %493 = vst.msk [vmem:[#allocation2 + $0x18] sm:$0xff] %vm84_vm0, %v491_v57 }
0x12e6   :  { %v807_v59 = vld [vmem:[#allocation2 + $0x8] sm:$0xff] }
0x12e7   :  { %v814_v0 = vpack.c.bf16 %v807_v59, %v806_v58 }
0x12e9   :  { %1888 = vmatprep.mubr.msk.bf16.mxu0 %vm84_vm0, %v814_v0 }
0x12ea   :  { %v809_v60 = vld [vmem:[#allocation2 + $0x18] sm:$0xff] }
0x12eb   :  { %v815_v61 = vpack.c.bf16 %v809_v60, %v808_v49 }
0x12ed   :  { %1889 = vmatmul.mubr.msk.bf16.vlgmr.msra.gmra.mrb[16].mxu0 %vm84_vm0, %v815_v61 }
0x12ee   :  { %1913 = vmatpush3.bf16.msra.mxu0 %v2368_v62 }
0x12ef   :  { %1914 = vmatprep.subr.bf16.mxu0 %v2123_v7 }
0x12f2   :  { %1915 = vmatpush3.bf16.msra.mxu0 %v2376_v63 }
0x12f3   :  { %1928 = vmatprep.subr.bf16.mxu0 %v2123_v7 }
0x1351   :  { %v732_v1 = vpop.permute.xlu1 %731 }
0x1352   :  { %1881 = vmatmul.mubr.msk.bf16.vlgmr.msra.gmra.mrb[20].mxu1 %vm84_vm0, %v732_v1 }
0x1353   :  { %1897 = vmatpush3.bf16.msra.mxu1 %v2368_v62  ;;  %1900 = vmatprep.mubr.msk.bf16.mxu1 %vm2124_vm1, %v2123_v7 }
0x1354   :  { %1898 = vmatprep.subr.bf16.mxu1 %v2123_v7 }
0x1357   :  { %1899 = vmatpush3.bf16.msra.mxu1 %v2376_v63 }
0x1358   :  { %1904 = vmatprep.subr.bf16.mxu1 %v2123_v7 }
0x135a   :  { %1901 = vmatmul.mubr.bf16.vlgmr.msra.gmra.mrb[24].mxu1 %v2125_v9 }
0x135b   :  { %1905 = vmatpush3.bf16.msra.mxu1 %v2368_v62  ;;  %1908 = vmatprep.mubr.msk.bf16.mxu1 %vm2124_vm1, %v2123_v7 }
0x135c   :  { %1906 = vmatprep.subr.bf16.mxu1 %v2123_v7 }
0x135f   :  { %1907 = vmatpush3.bf16.msra.mxu1 %v2376_v63 }
0x1360   :  { %1920 = vmatprep.subr.bf16.mxu1 %v2123_v7 }
0x13c0   :  { %v2394_v2 = vpop.f32.mrb[16].mxu0 }
0x13c1   :  { %v887_v17 = vpop.f32.mrb[17].mxu0 }
0x13c2   :  { %v2396_v3 = vpop.f32.mrb[18].mxu0  ;;  %v888_v18 = vadd.f32 %v2404_v16, %v887_v17 }
0x13c3   :  { %v2398_v4 = vpop.f32.mrb[19].mxu0 }
0x13c4   :  { %v891_v44 = vadd.f32 %v2404_v16, %v2398_v4 }
0x1425   :  { %v770_v10 = vpop.f32.mrb[20].mxu1 }
0x1426   :  { %v776_v9 = vadd.f32 %v770_v10, %v2240_v20  ;;  %v1882_v11 = vpop.f32.mrb[21].mxu1 }
0x1427   :  { %v773_v12 = vpop.f32.mrb[22].mxu1 }
0x1428   :  { %v1883_v14 = vpop.f32.mrb[23].mxu1  ;;  %v1710_v36 = vmul.f32 -1.442695, %v776_v9 }
0x142d   :  { %v977_v19 = vpop.f32.mrb[24].mxu1 }
0x142e   :  { %v983_v21 = vadd.f32 %v977_v19, %v888_v18  ;;  %v1902_v6 = vpop.f32.mrb[25].mxu1 }
0x142f   :  { %v980_v23 = vpop.f32.mrb[26].mxu1 }
0x1430   :  { %2051 = vtanh.f32 %v983_v21  ;;  %v1903_v25 = vpop.f32.mrb[27].mxu1  ;;  %v1720_v20 = vmul.f32 -1.442695, %v983_v21 }
0x1432   :  { %2053 = vpow2.f32 %v1720_v20 }
0x143a   :  { %v2052_v26 = vpop.eup %2051 }
0x143b   :  { %993 = vrot.lane.b32.xlu0 %v2052_v26, %s2126_s3 }
0x143c   :  { %v2054_v15 = vpop.eup %2053 }
0x143d   :  { %v987_v8 = vadd.f32 1.0, %v2054_v15 }
0x143f   :  { %2055 = vrcp.f32 %v987_v8 }
0x1449   :  { %v2056_v27 = vpop.eup %2055 }
0x144a   :  { %v991_v30 = vmul.f32 0.0, %v2056_v27 }
0x14ad   :  { %v994_v28 = vpop.permute.xlu0 %993 }
0x14ae   :  { %v996_v24 = vmul.f32 %v2056_v27, %v994_v28  ;;  %v896_v28 = vadd.f32 %v2394_v2, %v2404_v16 }
0x14b0   :  { %998 = vrot.lane.b32.xlu1 %v996_v24, %s2127_s24 }
0x1522   :  { %v999_v31 = vpop.permute.xlu1 %998 }
0x1523   :  { %v1001_v33 = vadd.f32 %v999_v31, %v991_v30 }
0x1525   :  { %2057 = vtanh.f32 %v1001_v33 }
0x1526   :  { %2059 = vtanh.f32 %v776_v9 }
0x1527   :  { %2061 = vpow2.f32 %v1710_v36 }
0x152f   :  { %v2058_v34 = vpop.eup %2057 }
0x1530   :  { %1004 = vrot.lane.b32.xlu0 %v2058_v34, %s2126_s3  ;;  %v2060_v35 = vpop.eup %2059 }
0x1531   :  { %v2062_v37 = vpop.eup %2061 }
0x1532   :  { %v780_v38 = vadd.f32 1.0, %v2062_v37 }
0x1534   :  { %786 = vrot.lane.b32.xlu0 %v2060_v35, %s2126_s3  ;;  %2063 = vrcp.f32 %v780_v38 }
0x153e   :  { %v2064_v42 = vpop.eup %2063 }
0x153f   :  { %v784_v22 = vmul.f32 %v2064_v42, %v2340_v48 }
0x15a2   :  { %v1005_v39 = vpop.permute.xlu0 %1004 }
0x15a3   :  { %v2411_v40 = vmul.f32 %v2056_v27, %v1005_v39 }
0x15a5   :  { %v1014_v41 = vpack.c.bf16 %v2411_v40, %v2411_v40 }
0x15a6   :  { %v787_v43 = vpop.permute.xlu0 %786 }
0x15a7   :  { %v789_v45 = vmul.f32 %v2064_v42, %v787_v43  ;;  %1016 = vrot.lane.b32.xlu1 %v1014_v41, %s2127_s24 }
0x15a9   :  { %791 = vrot.lane.b32.xlu0 %v789_v45, %s2127_s24 }
0x1619   :  { %v1017_v46 = vpop.permute.xlu1 %1016 }
0x161a   :  { %1909 = vmatmul.mubr.msk.bf16.vlgmr.msra.gmra.mrb[28].mxu1 %vm84_vm0, %v1017_v46 }
0x161b   :  { %v792_v13 = vpop.permute.xlu0 %791  ;;  %1921 = vmatpush3.bf16.msra.mxu1 %v2368_v62  ;;  %1924 = vmatprep.mubr.msk.bf16.mxu1 %vm2124_vm1, %v2123_v7 }
0x161c   :  { %v794_v47 = vadd.f32 %v792_v13, %v784_v22  ;;  %1922 = vmatprep.subr.bf16.mxu1 %v2123_v7 }
0x161e   :  { %2065 = vtanh.f32 %v794_v47 }
0x161f   :  { %1923 = vmatpush3.bf16.msra.mxu1 %v2376_v63 }
0x1620   :  { %1936 = vmatprep.subr.bf16.mxu1 %v2123_v7 }
0x1628   :  { %v2066_v50 = vpop.eup %2065 }
0x1629   :  { %797 = vrot.lane.b32.xlu0 %v2066_v50, %s2126_s3 }
0x162d   :  { %568 = vrot.lane.b32.xlu0 %v2311_v5, %s2127_s24 }
0x1631   :  { %724 = vrot.lane.b32.xlu0 %v2357_v54, %s2127_s24 }
0x169b   :  { %v798_v48 = vpop.permute.xlu0 %797 }
0x169c   :  { %v800_v10 = vmul.f32 %v2064_v42, %v798_v48  ;;  %v899_v48 = vadd.f32 %v2396_v3, %v2404_v16 }
0x169f   :  { %v569_v51 = vpop.permute.xlu0 %568 }
0x16a0   :  { %571 = vst.msk [vmem:[#allocation2 + $0x20] sm:$0xff] %vm84_vm0, %v569_v51 }
0x16a3   :  { %v725_v52 = vpop.permute.xlu0 %724 }
0x16a4   :  { %727 = vst.msk [vmem:[#allocation2 + $0x30] sm:$0xff] %vm84_vm0, %v725_v52 }
0x16a7   :  { %v810_v19 = vld [vmem:[#allocation2 + $0x20] sm:$0xff] }
0x16ab   :  { %v812_v6 = vld [vmem:[#allocation2 + $0x30] sm:$0xff] }
0x16ed   :  { %v1055_v29 = vpop.f32.mrb[28].mxu1 }
0x16ee   :  { %v1061_v53 = vadd.f32 %v1055_v29, %v891_v44  ;;  %v1910_v55 = vpop.f32.mrb[29].mxu1 }
0x16ef   :  { %v1058_v56 = vpop.f32.mrb[30].mxu1 }
0x16f0   :  { %2067 = vtanh.f32 %v1061_v53  ;;  %v1911_v57 = vpop.f32.mrb[31].mxu1  ;;  %v1722_v54 = vmul.f32 -1.442695, %v1061_v53 }
0x16f2   :  { %2069 = vpow2.f32 %v1722_v54 }
0x16fa   :  { %v2068_v5 = vpop.eup %2067 }
0x16fb   :  { %1071 = vrot.lane.b32.xlu1 %v2068_v5, %s2126_s3 }
0x16fc   :  { %v2070_v58 = vpop.eup %2069 }
0x16fd   :  { %v1065_v59 = vadd.f32 1.0, %v2070_v58 }
0x16ff   :  { %2071 = vrcp.f32 %v1065_v59 }
0x1709   :  { %v2072_v0 = vpop.eup %2071 }
0x170a   :  { %v1069_v61 = vmul.f32 %v2072_v0, %v1001_v33 }
0x176d   :  { %v1072_v49 = vpop.permute.xlu1 %1071 }
0x176e   :  { %v1074_v60 = vmul.f32 %v2072_v0, %v1072_v49 }
0x1770   :  { %1076 = vrot.lane.b32.xlu1 %v1074_v60, %s2127_s24 }
0x17e2   :  { %v1077_v1 = vpop.permute.xlu1 %1076 }
0x17e3   :  { %v1079_v17 = vadd.f32 %v1077_v1, %v1069_v61 }
0x17e5   :  { %2073 = vtanh.f32 %v1079_v17 }
0x17ef   :  { %v2074_v4 = vpop.eup %2073 }
0x17f0   :  { %1082 = vrot.lane.b32.xlu1 %v2074_v4, %s2126_s3 }
0x17f4   :  { %646 = vrot.lane.b32.xlu1 %v2327_v32, %s2127_s24 }
0x17f8   :  { %802 = vrot.lane.b32.xlu1 %v800_v10, %s2127_s24 }
0x1862   :  { %v1083_v9 = vpop.permute.xlu1 %1082 }
0x1863   :  { %v2440_v11 = vmul.f32 %v2072_v0, %v1083_v9 }
0x1865   :  { %v1092_v12 = vpack.c.bf16 %v2440_v11, %v2440_v11 }
0x1866   :  { %v647_v14 = vpop.permute.xlu1 %646 }
0x1867   :  { %649 = vst.msk [vmem:[#allocation2 + $0x28] sm:$0xff] %vm84_vm0, %v647_v14  ;;  %1094 = vrot.lane.b32.xlu0 %v1092_v12, %s2127_s24 }
0x186a   :  { %v803_v18 = vpop.permute.xlu1 %802 }
0x186b   :  { %805 = vst.msk [vmem:[#allocation2 + $0x38] sm:$0xff] %vm84_vm0, %v803_v18 }
0x186e   :  { %v811_v21 = vld [vmem:[#allocation2 + $0x28] sm:$0xff] }
0x186f   :  { %v816_v32 = vpack.c.bf16 %v811_v21, %v810_v19 }
0x1871   :  { %1892 = vmatprep.mubr.msk.bf16.mxu0 %vm84_vm0, %v816_v32 }
0x1872   :  { %v813_v23 = vld [vmem:[#allocation2 + $0x38] sm:$0xff] }
0x1873   :  { %v817_v25 = vpack.c.bf16 %v813_v23, %v812_v6 }
0x1875   :  { %1893 = vmatmul.mubr.msk.bf16.gmra.mrb[20].mxu0 %vm84_vm0, %v817_v25 }
0x1876   :  { %1916 = vmatprep.mubr.msk.bf16.mxu0 %vm2124_vm1, %v2123_v7 }
0x18d9   :  { %v1095_v26 = vpop.permute.xlu0 %1094 }
0x18da   :  { %1917 = vmatmul.mubr.msk.bf16.vlgmr.msra.gmra.mrb[24].mxu0 %vm84_vm0, %v1095_v26 }
0x18db   :  { %1929 = vmatpush3.bf16.msra.mxu0 %v2368_v62  ;;  %1932 = vmatprep.mubr.msk.bf16.mxu0 %vm2124_vm1, %v2123_v7 }
0x18dc   :  { %1930 = vmatprep.subr.bf16.mxu0 %v2123_v7 }
0x18df   :  { %1931 = vmatpush3.bf16.msra.mxu0 %v2376_v63 }
0x18e0   :  { %1944 = vmatprep.subr.bf16.mxu0 %v2123_v7 }
0x1948   :  { %v2458_v20 = vpop.f32.mrb[20].mxu0 }
0x1949   :  { %v2460_v15 = vpop.f32.mrb[21].mxu0 }
0x194a   :  { %v2462_v8 = vpop.f32.mrb[22].mxu0  ;;  %v904_v10 = vadd.f32 %v2404_v16, %v2460_v15 }
0x194b   :  { %v2464_v27 = vpop.f32.mrb[23].mxu0 }
0x19ad   :  { %v1133_v24 = vpop.f32.mrb[24].mxu0 }
0x19ae   :  { %v1139_v30 = vadd.f32 %v1133_v24, %v896_v28  ;;  %v1918_v31 = vpop.f32.mrb[25].mxu0 }
0x19af   :  { %v1136_v33 = vpop.f32.mrb[26].mxu0 }
0x19b0   :  { %2075 = vtanh.f32 %v1139_v30  ;;  %v1919_v34 = vpop.f32.mrb[27].mxu0  ;;  %v1724_v36 = vmul.f32 -1.442695, %v1139_v30 }
0x19b2   :  { %2077 = vpow2.f32 %v1724_v36 }
0x19ba   :  { %v2076_v35 = vpop.eup %2075 }
0x19bb   :  { %1149 = vrot.lane.b32.xlu1 %v2076_v35, %s2126_s3 }
0x19bc   :  { %v2078_v37 = vpop.eup %2077 }
0x19bd   :  { %v1143_v38 = vadd.f32 1.0, %v2078_v37  ;;  %v907_v37 = vadd.f32 %v2404_v16, %v2464_v27 }
0x19bf   :  { %2079 = vrcp.f32 %v1143_v38 }
0x19c9   :  { %v2080_v39 = vpop.eup %2079 }
0x19ca   :  { %v1147_v2 = vmul.f32 %v2080_v39, %v1079_v17 }
0x1a2d   :  { %v1150_v41 = vpop.permute.xlu1 %1149 }
0x1a2e   :  { %v1152_v42 = vmul.f32 %v2080_v39, %v1150_v41 }
0x1a30   :  { %1154 = vrot.lane.b32.xlu0 %v1152_v42, %s2127_s24 }
0x1aa2   :  { %v1155_v43 = vpop.permute.xlu0 %1154 }
0x1aa3   :  { %v1157_v45 = vadd.f32 %v1155_v43, %v1147_v2 }
0x1aa5   :  { %2081 = vtanh.f32 %v1157_v45 }
0x1aaf   :  { %v2082_v46 = vpop.eup %2081 }
0x1ab0   :  { %1160 = vrot.lane.b32.xlu1 %v2082_v46, %s2126_s3 }
0x1b22   :  { %v1161_v22 = vpop.permute.xlu1 %1160 }
0x1b23   :  { %v2471_v13 = vmul.f32 %v2080_v39, %v1161_v22 }
0x1b25   :  { %v1170_v47 = vpack.c.bf16 %v2471_v13, %v2471_v13 }
0x1b27   :  { %1172 = vrot.lane.b32.xlu0 %v1170_v47, %s2127_s24 }
0x1b99   :  { %v1173_v50 = vpop.permute.xlu0 %1172 }
0x1b9a   :  { %1925 = vmatmul.mubr.msk.bf16.vlgmr.msra.gmra.mrb[32].mxu1 %vm84_vm0, %v1173_v50 }
0x1b9b   :  { %1937 = vmatpush3.bf16.msra.mxu1 %v2368_v62  ;;  %1940 = vmatprep.mubr.msk.bf16.mxu1 %vm2124_vm1, %v2123_v7 }
0x1b9c   :  { %1938 = vmatprep.subr.bf16.mxu1 %v2123_v7 }
0x1b9f   :  { %1939 = vmatpush3.bf16.msra.mxu1 %v2376_v63 }
0x1ba0   :  { %1952 = vmatprep.subr.bf16.mxu1 %v2123_v7 }
0x1c6d   :  { %v1211_v51 = vpop.f32.mrb[32].mxu1 }
0x1c6e   :  { %v1217_v52 = vadd.f32 %v1211_v51, %v899_v48  ;;  %v1926_v44 = vpop.f32.mrb[33].mxu1 }
0x1c6f   :  { %v1214_v29 = vpop.f32.mrb[34].mxu1 }
0x1c70   :  { %2083 = vtanh.f32 %v1217_v52  ;;  %v1927_v53 = vpop.f32.mrb[35].mxu1  ;;  %v1726_v56 = vmul.f32 -1.442695, %v1217_v52 }
0x1c71   :  { %v912_v53 = vadd.f32 %v2458_v20, %v2404_v16 }
0x1c72   :  { %2085 = vpow2.f32 %v1726_v56 }
0x1c7a   :  { %v2084_v55 = vpop.eup %2083 }
0x1c7b   :  { %1227 = vrot.lane.b32.xlu1 %v2084_v55, %s2126_s3 }
0x1c7c   :  { %v2086_v57 = vpop.eup %2085 }
0x1c7d   :  { %v1221_v5 = vadd.f32 1.0, %v2086_v57 }
0x1c7f   :  { %2087 = vrcp.f32 %v1221_v5 }
0x1c89   :  { %v2088_v54 = vpop.eup %2087 }
0x1c8a   :  { %v1225_v3 = vmul.f32 %v2088_v54, %v1157_v45 }
0x1ced   :  { %v1228_v58 = vpop.permute.xlu1 %1227 }
0x1cee   :  { %v1230_v59 = vmul.f32 %v2088_v54, %v1228_v58 }
0x1cf0   :  { %1232 = vrot.lane.b32.xlu0 %v1230_v59, %s2127_s24 }
0x1d62   :  { %v1233_v0 = vpop.permute.xlu0 %1232 }
0x1d63   :  { %v1235_v49 = vadd.f32 %v1233_v0, %v1225_v3 }
0x1d65   :  { %2089 = vtanh.f32 %v1235_v49 }
0x1d6f   :  { %v2090_v60 = vpop.eup %2089 }
0x1d70   :  { %1238 = vrot.lane.b32.xlu1 %v2090_v60, %s2126_s3 }
0x1de2   :  { %v1239_v61 = vpop.permute.xlu1 %1238 }
0x1de3   :  { %v2488_v1 = vmul.f32 %v2088_v54, %v1239_v61 }
0x1de5   :  { %v1248_v17 = vpack.c.bf16 %v2488_v1, %v2488_v1 }
0x1de7   :  { %1250 = vrot.lane.b32.xlu0 %v1248_v17, %s2127_s24 }
0x1e59   :  { %v1251_v4 = vpop.permute.xlu0 %1250 }
0x1e5a   :  { %1933 = vmatmul.mubr.msk.bf16.vlgmr.msra.gmra.mrb[28].mxu0 %vm84_vm0, %v1251_v4 }
0x1e5b   :  { %1945 = vmatpush3.bf16.msra.mxu0 %v2368_v62  ;;  %1948 = vmatprep.mubr.msk.bf16.mxu0 %vm2124_vm1, %v2123_v7 }
0x1e5c   :  { %1946 = vmatprep.subr.bf16.mxu0 %v2123_v7 }
0x1e5f   :  { %1947 = vmatpush3.bf16.msra.mxu0 %v2376_v63 }
0x1f2d   :  { %v1289_v9 = vpop.f32.mrb[28].mxu0 }
0x1f2e   :  { %v1295_v12 = vadd.f32 %v1289_v9, %v904_v10  ;;  %v1934_v14 = vpop.f32.mrb[29].mxu0 }
0x1f2f   :  { %v1292_v18 = vpop.f32.mrb[30].mxu0 }
0x1f30   :  { %2091 = vtanh.f32 %v1295_v12  ;;  %v1935_v19 = vpop.f32.mrb[31].mxu0  ;;  %v1728_v32 = vmul.f32 -1.442695, %v1295_v12 }
0x1f31   :  { %v915_v19 = vadd.f32 %v2462_v8, %v2404_v16 }
0x1f32   :  { %2093 = vpow2.f32 %v1728_v32 }
0x1f3a   :  { %v2092_v21 = vpop.eup %2091 }
0x1f3b   :  { %1305 = vrot.lane.b32.xlu1 %v2092_v21, %s2126_s3 }
0x1f3c   :  { %v2094_v6 = vpop.eup %2093 }
0x1f3d   :  { %v1299_v23 = vadd.f32 1.0, %v2094_v6 }
0x1f3f   :  { %2095 = vrcp.f32 %v1299_v23 }
0x1f49   :  { %v2096_v25 = vpop.eup %2095 }
0x1f4a   :  { %v1303_v15 = vmul.f32 %v2096_v25, %v1235_v49 }
0x1fad   :  { %v1306_v26 = vpop.permute.xlu1 %1305 }
0x1fae   :  { %v1308_v28 = vmul.f32 %v2096_v25, %v1306_v26 }
0x1fb0   :  { %1310 = vrot.lane.b32.xlu0 %v1308_v28, %s2127_s24 }
0x2022   :  { %v1311_v24 = vpop.permute.xlu0 %1310 }
0x2023   :  { %v1313_v30 = vadd.f32 %v1311_v24, %v1303_v15 }
0x2025   :  { %2097 = vtanh.f32 %v1313_v30 }
0x202f   :  { %v2098_v31 = vpop.eup %2097 }
0x2030   :  { %1316 = vrot.lane.b32.xlu1 %v2098_v31, %s2126_s3 }
0x20a2   :  { %v1317_v33 = vpop.permute.xlu1 %1316 }
0x20a3   :  { %v2504_v34 = vmul.f32 %v2096_v25, %v1317_v33 }
0x20a5   :  { %v1326_v35 = vpack.c.bf16 %v2504_v34, %v2504_v34 }
0x20a7   :  { %1328 = vrot.lane.b32.xlu0 %v1326_v35, %s2127_s24 }
0x2119   :  { %v1329_v36 = vpop.permute.xlu0 %1328 }
0x211a   :  { %1941 = vmatmul.mubr.msk.bf16.vlgmr.msra.gmra.mrb[36].mxu1 %vm84_vm0, %v1329_v36 }
0x211b   :  { %1953 = vmatpush3.bf16.msra.mxu1 %v2368_v62  ;;  %1956 = vmatprep.mubr.msk.bf16.mxu1 %vm2124_vm1, %v2123_v7 }
0x211c   :  { %1954 = vmatprep.subr.bf16.mxu1 %v2123_v7 }
0x211f   :  { %1955 = vmatpush3.bf16.msra.mxu1 %v2376_v63 }
0x21ed   :  { %v1367_v38 = vpop.f32.mrb[36].mxu1 }
0x21ee   :  { %v1373_v39 = vadd.f32 %v1367_v38, %v907_v37  ;;  %v1942_v41 = vpop.f32.mrb[37].mxu1  ;;  %v1994_v38 = vld [vmem:[%s2604_s7 + $0x8] sm:$0xff]  }
0x21ef   :  { %v1370_v42 = vpop.f32.mrb[38].mxu1 }
0x21f0   :  { %2099 = vtanh.f32 %v1373_v39  ;;  %v1943_v2 = vpop.f32.mrb[39].mxu1  ;;  %v1730_v62 = vmul.f32 -1.442695, %v1373_v39 }
0x21f2   :  { %2101 = vpow2.f32 %v1730_v62 }
0x21fa   :  { %v2100_v43 = vpop.eup %2099 }
0x21fb   :  { %1383 = vrot.lane.b32.xlu1 %v2100_v43, %s2126_s3 }
0x21fc   :  { %v2102_v45 = vpop.eup %2101 }
0x21fd   :  { %v1377_v46 = vadd.f32 1.0, %v2102_v45 }
0x21ff   :  { %2103 = vrcp.f32 %v1377_v46 }
0x2209   :  { %v2104_v7 = vpop.eup %2103 }
0x220a   :  { %v1381_v27 = vmul.f32 %v2104_v7, %v1313_v30 }
0x226d   :  { %v1384_v22 = vpop.permute.xlu1 %1383 }
0x226e   :  { %v1386_v63 = vmul.f32 %v2104_v7, %v1384_v22 }
0x2270   :  { %1388 = vrot.lane.b32.xlu0 %v1386_v63, %s2127_s24 }
0x22e2   :  { %v1389_v47 = vpop.permute.xlu0 %1388 }
0x22e3   :  { %v1391_v50 = vadd.f32 %v1389_v47, %v1381_v27 }
0x22e5   :  { %2105 = vtanh.f32 %v1391_v50 }
0x22ef   :  { %v2106_v48 = vpop.eup %2105 }
0x22f0   :  { %1394 = vrot.lane.b32.xlu1 %v2106_v48, %s2126_s3 }
0x2362   :  { %v1395_v51 = vpop.permute.xlu1 %1394 }
0x2363   :  { %v2520_v52 = vmul.f32 %v2104_v7, %v1395_v51 }
0x2365   :  { %v1404_v44 = vpack.c.bf16 %v2520_v52, %v2520_v52 }
0x2367   :  { %1406 = vrot.lane.b32.xlu0 %v1404_v44, %s2127_s24  ;;  %v1735_v44 = vld [vmem:[%s2605_s8] ss:$0 sm:$0xff] }
0x23d9   :  { %v1407_v29 = vpop.permute.xlu0 %1406 }
0x23da   :  { %1949 = vmatmul.mubr.msk.bf16.vlgmr.msra.gmra.mrb[32].mxu0 %vm84_vm0, %v1407_v29 }
0x24ad   :  { %v1445_v55 = vpop.f32.mrb[32].mxu0 }
0x24ae   :  { %v1451_v56 = vadd.f32 %v1445_v55, %v912_v53  ;;  %v1950_v57 = vpop.f32.mrb[33].mxu0 }
0x24af   :  { %v1448_v5 = vpop.f32.mrb[34].mxu0 }
0x24b0   :  { %2107 = vtanh.f32 %v1451_v56  ;;  %v1951_v54 = vpop.f32.mrb[35].mxu0  ;;  %v1732_v59 = vmul.f32 -1.442695, %v1451_v56 }
0x24b2   :  { %2109 = vpow2.f32 %v1732_v59 }
0x24ba   :  { %v2108_v58 = vpop.eup %2107 }
0x24bb   :  { %1461 = vrot.lane.b32.xlu1 %v2108_v58, %s2126_s3 }
0x24bc   :  { %v2110_v3 = vpop.eup %2109 }
0x24bd   :  { %v1455_v0 = vadd.f32 1.0, %v2110_v3 }
0x24bf   :  { %2111 = vrcp.f32 %v1455_v0 }
0x24c9   :  { %v2112_v49 = vpop.eup %2111 }
0x24ca   :  { %v1459_v20 = vmul.f32 %v2112_v49, %v1391_v50 }
0x252d   :  { %v1462_v60 = vpop.permute.xlu1 %1461 }
0x252e   :  { %v1464_v61 = vmul.f32 %v2112_v49, %v1462_v60 }
0x2530   :  { %1466 = vrot.lane.b32.xlu0 %v1464_v61, %s2127_s24 }
0x25a2   :  { %v1467_v17 = vpop.permute.xlu0 %1466 }
0x25a3   :  { %v1469_v4 = vadd.f32 %v1467_v17, %v1459_v20 }
0x25a5   :  { %2113 = vtanh.f32 %v1469_v4 }
0x25af   :  { %v2114_v10 = vpop.eup %2113 }
0x25b0   :  { %1472 = vrot.lane.b32.xlu1 %v2114_v10, %s2126_s3 }
0x2622   :  { %v1473_v9 = vpop.permute.xlu1 %1472 }
0x2623   :  { %v1475_v12 = vmul.f32 %v2112_v49, %v1473_v9 }
0x2625   :  { %v1482_v14 = vpack.c.bf16 %v1475_v12, %v1475_v12 }
0x2627   :  { %1484 = vrot.lane.b32.xlu0 %v1482_v14, %s2127_s24 }
0x2699   :  { %v1485_v18 = vpop.permute.xlu0 %1484 }
0x269a   :  { %1957 = vmatmul.mubr.msk.bf16.vlgmr.msra.gmra.mrb[40].mxu1 %vm84_vm0, %v1485_v18 }
0x276d   :  { %v1523_v21 = vpop.f32.mrb[40].mxu1 }
0x276e   :  { %v1529_v32 = vadd.f32 %v1523_v21, %v915_v19  ;;  %v1958_v6 = vpop.f32.mrb[41].mxu1 }
0x276f   :  { %v1526_v23 = vpop.f32.mrb[42].mxu1 }
0x2770   :  { %2115 = vtanh.f32 %v1529_v32  ;;  %v1959_v25 = vpop.f32.mrb[43].mxu1  ;;  %v1734_v28 = vmul.f32 -1.442695, %v1529_v32 }
0x2772   :  { %2117 = vpow2.f32 %v1734_v28 }
0x277a   :  { %v2116_v26 = vpop.eup %2115 }
0x277b   :  { %1539 = vrot.lane.b32.xlu1 %v2116_v26, %s2126_s3 }
0x277c   :  { %v2118_v15 = vpop.eup %2117 }
0x277d   :  { %v1533_v24 = vadd.f32 1.0, %v2118_v15 }
0x277f   :  { %2119 = vrcp.f32 %v1533_v24 }
0x2789   :  { %v2120_v30 = vpop.eup %2119 }
0x278a   :  { %v1537_v16 = vmul.f32 %v2120_v30, %v1469_v4 }
0x27ed   :  { %v1540_v31 = vpop.permute.xlu1 %1539 }
0x27ee   :  { %v1542_v33 = vmul.f32 %v2120_v30, %v1540_v31 }
0x27f0   :  { %1544 = vrot.lane.b32.xlu0 %v1542_v33, %s2127_s24 }
0x27f4   :  { %1009 = vrot.lane.b32.xlu0 %v2411_v40, %s2127_s24  ;;  %v1993_v40 = vld [vmem:[%s2604_s7] sm:$0xff]  }
0x27f5   :  { %1960 = vmatprep.subr.bf16.mxu0 %v1993_v40 }
0x27f6   :  { %1961 = vmatpush3.bf16.msra.mxu0 %v1993_v40 }
0x27f7   :  { %1962 = vmatprep.subr.bf16.mxu0 %v1994_v38 }
0x27f8   :  { %1165 = vrot.lane.b32.xlu0 %v2471_v13, %s2127_s24 }
0x27fa   :  { %1963 = vmatpush3.bf16.msra.mxu0 %v1994_v38 }
0x27fc   :  { %1321 = vrot.lane.b32.xlu0 %v2504_v34, %s2127_s24 }
0x2800   :  { %1477 = vrot.lane.b32.xlu0 %v1475_v12, %s2127_s24 }
0x2862   :  { %v1545_v8 = vpop.permute.xlu0 %1544 }
0x2863   :  { %v1547_v35 = vadd.f32 %v1545_v8, %v1537_v16 }
0x2865   :  { %2121 = vtanh.f32 %v1547_v35 }
0x2866   :  { %v1010_v36 = vpop.permute.xlu0 %1009 }
0x2867   :  { %1012 = vst.msk [vmem:[#allocation2] sm:$0xff] %vm84_vm0, %v1010_v36 }
0x286a   :  { %v1166_v37 = vpop.permute.xlu0 %1165 }
0x286b   :  { %1168 = vst.msk [vmem:[#allocation2 + $0x10] sm:$0xff] %vm84_vm0, %v1166_v37 }
0x286e   :  { %v1322_v13 = vpop.permute.xlu0 %1321  ;;  %v1559_v45 = vld [vmem:[#allocation2] sm:$0xff] }
0x286f   :  { %v2122_v34 = vpop.eup %2121  ;;  %1324 = vst.msk [vmem:[#allocation2 + $0x20] sm:$0xff] %vm84_vm0, %v1322_v13 }
0x2870   :  { %1550 = vrot.lane.b32.xlu1 %v2122_v34, %s2126_s3 }
0x2872   :  { %v1478_v39 = vpop.permute.xlu0 %1477 }
0x2873   :  { %1480 = vst.msk [vmem:[#allocation2 + $0x30] sm:$0xff] %vm84_vm0, %v1478_v39 }
0x2874   :  { %1087 = vrot.lane.b32.xlu1 %v2440_v11, %s2127_s24 }
0x2876   :  { %v1563_v63 = vld [vmem:[#allocation2 + $0x20] sm:$0xff] }
0x2878   :  { %1243 = vrot.lane.b32.xlu1 %v2488_v1, %s2127_s24  ;;  %v1561_v1 = vld [vmem:[#allocation2 + $0x10] sm:$0xff] }
0x287a   :  { %v1565_v48 = vld [vmem:[#allocation2 + $0x30] sm:$0xff] }
0x287c   :  { %1399 = vrot.lane.b32.xlu1 %v2520_v52, %s2127_s24 }
0x28e2   :  { %v1551_v41 = vpop.permute.xlu1 %1550 }
0x28e3   :  { %v1553_v42 = vmul.f32 %v2120_v30, %v1551_v41 }
0x28e5   :  { %1555 = vrot.lane.b32.xlu1 %v1553_v42, %s2127_s24 }
0x28e6   :  { %v1088_v2 = vpop.permute.xlu1 %1087 }
0x28e7   :  { %1090 = vst.msk [vmem:[#allocation2 + $0x8] sm:$0xff] %vm84_vm0, %v1088_v2 }
0x28ea   :  { %v1244_v43 = vpop.permute.xlu1 %1243 }
0x28eb   :  { %1246 = vst.msk [vmem:[#allocation2 + $0x18] sm:$0xff] %vm84_vm0, %v1244_v43 }
0x28ee   :  { %v1400_v62 = vpop.permute.xlu1 %1399  ;;  %v1560_v46 = vld [vmem:[#allocation2 + $0x8] sm:$0xff] }
0x28ef   :  { %1402 = vst.msk [vmem:[#allocation2 + $0x28] sm:$0xff] %vm84_vm0, %v1400_v62  ;;  %v1567_v11 = vpack.c.bf16 %v1560_v46, %v1559_v45 }
0x28f1   :  { %1964 = vmatprep.mubr.msk.bf16.mxu0 %vm84_vm0, %v1567_v11 }
0x28f2   :  { %v1562_v7 = vld [vmem:[#allocation2 + $0x18] sm:$0xff] }
0x28f3   :  { %v1568_v22 = vpack.c.bf16 %v1562_v7, %v1561_v1 }
0x28f5   :  { %1965 = vmatmul.mubr.msk.bf16.vlgmr.msra.gmra.mrb[36].mxu0 %vm84_vm0, %v1568_v22 }
0x28f6   :  { %v1564_v27 = vld [vmem:[#allocation2 + $0x28] sm:$0xff] }
0x28f7   :  { %v1569_v47 = vpack.c.bf16 %v1564_v27, %v1563_v63 }
0x28f9   :  { %1968 = vmatprep.mubr.msk.bf16.mxu0 %vm84_vm0, %v1569_v47 }
0x2957   :  { %v1556_v50 = vpop.permute.xlu1 %1555 }
0x2958   :  { %1558 = vst.msk [vmem:[#allocation2 + $0x38] sm:$0xff] %vm84_vm0, %v1556_v50 }
0x295f   :  { %v1566_v51 = vld [vmem:[#allocation2 + $0x38] sm:$0xff] }
0x2960   :  { %v1570_v52 = vpack.c.bf16 %v1566_v51, %v1565_v48 }
0x2962   :  { %1969 = vmatmul.mubr.msk.bf16.gmra.mrb[40].mxu0 %vm84_vm0, %v1570_v52 }
0x29c8   :  { %v1966_v29 = vpop.f32.mrb[36].mxu0 }
0x29c9   :  { %v1649_v53 = vadd.f32 %v1966_v29, %v1735_v44  ;;  %v1640_v55 = vpop.f32.mrb[37].mxu0 }
0x29ca   :  { %v1641_v56 = vadd.f32 %v1735_v44, %v1640_v55  ;;  %v1967_v57 = vpop.f32.mrb[38].mxu0 }
0x29cb   :  { %1673 = vst [vmem:[%s2606_s9 + $0x10] sm:$0xff] %v1649_v53  ;;  %v1652_v5 = vadd.f32 %v1967_v57, %v1735_v44  ;;  %v1643_v54 = vpop.f32.mrb[39].mxu0 }
0x29cc   :  { %1671 = vst [vmem:[%s2606_s9] sm:$0xff] %v1641_v56  ;;  %v1644_v58 = vadd.f32 %v1735_v44, %v1643_v54 }
0x29cd   :  { %1674 = vst [vmem:[%s2606_s9 + $0x18] sm:$0xff] %v1652_v5 }
0x29ce   :  { %1672 = vst [vmem:[%s2606_s9 + $0x8] sm:$0xff] %v1644_v58 }
0x2a35   :  { %v1970_v59 = vpop.f32.mrb[40].mxu0 }
0x2a36   :  { %v1665_v3 = vadd.f32 %v1970_v59, %v1735_v44  ;;  %v1656_v0 = vpop.f32.mrb[41].mxu0 }
0x2a37   :  { %v1657_v49 = vadd.f32 %v1735_v44, %v1656_v0  ;;  %v1971_v60 = vpop.f32.mrb[42].mxu0 }
0x2a38   :  { %1677 = vst [vmem:[%s2606_s9 + $0x30] sm:$0xff] %v1665_v3  ;;  %v1668_v61 = vadd.f32 %v1971_v60, %v1735_v44  ;;  %v1659_v20 = vpop.f32.mrb[43].mxu0 }
0x2a39   :  { %1675 = vst [vmem:[%s2606_s9 + $0x20] sm:$0xff] %v1657_v49  ;;  %v1660_v17 = vadd.f32 %v1735_v44, %v1659_v20 }
0x2a3a   :  { %1678 = vst [vmem:[%s2606_s9 + $0x38] sm:$0xff] %v1668_v61 }
0x2a3b   :  { %1676 = vst [vmem:[%s2606_s9 + $0x28] sm:$0xff] %v1660_v17 }

</bundles_post_ra>
